<compile_context>
chip_gen: v6e
topology: v6e:2x2x1
jax: 0.10.0
libtpu: 0.0.40
codegen_flags: <defaults>
</compile_context>

<pallas_src>
import math
import functools

import jax
import jax.numpy as jnp
from jax.experimental import pallas as pl
from jax.experimental.pallas import tpu as pltpu


_PARAM_ORDER = ("wqkv", "bqkv", "wo", "bo", "g1", "be1",
                "w1", "b1", "w2", "b2", "g2", "be2")


# ----------------------------- Pallas kernel ---------------------------------
def _encoder_kernel(x_ref,
                    wqkv_ref, bqkv_ref, wo_ref, bo_ref,
                    g1_ref, be1_ref,
                    w1_ref, b1_ref, w2_ref, b2_ref,
                    g2_ref, be2_ref,
                    o_ref, act_ref,
                    *, num_heads: int):
    """One TransformerBlock per grid step. Grid = (batch, layer)."""
    l = pl.program_id(1)
    S, D = x_ref.shape
    H = num_heads
    d_k = D // H
    eps = 1e-6
    scale = 1.0 / math.sqrt(d_k)

    # Layer 0 for this batch row: seed the resident activation from the input.
    @pl.when(l == 0)
    def _():
        act_ref[...] = x_ref[...].astype(jnp.float32)

    x = act_ref[...]                                        # (S, D), f32

    def layernorm(t, g_ref, b_ref):
        # torch semantics: unbiased std (Bessel /(D-1)), denominator (std + eps).
        mean = jnp.sum(t, axis=-1, keepdims=True) * (1.0 / D)
        d = t - mean                                        # two-pass: no cancellation
        var = jnp.sum(d * d, axis=-1, keepdims=True) * (1.0 / (D - 1))
        inv = pl.reciprocal(jnp.sqrt(var) + eps, approx=False)
        return g_ref[...] * d * inv + b_ref[...]

    # ---- multi-head self-attention ------------------------------------------
    # (3, D, D) slab: q/k/v weights selected by leading-dim index (no lane slicing).
    q = jnp.dot(x, wqkv_ref[0], preferred_element_type=jnp.float32) + bqkv_ref[0]
    k = jnp.dot(x, wqkv_ref[1], preferred_element_type=jnp.float32) + bqkv_ref[1]
    v = jnp.dot(x, wqkv_ref[2], preferred_element_type=jnp.float32) + bqkv_ref[2]

    qh = q.reshape(S, H, d_k)
    kh = k.reshape(S, H, d_k)
    vh = v.reshape(S, H, d_k)

    # Head-batched contractions: single dot_general each, no per-head loop.
    s = jnp.einsum("qhd,khd->hqk", qh, kh,
                   preferred_element_type=jnp.float32) * scale       # (H, S, S)
    s = s - jnp.max(s, axis=-1, keepdims=True)
    e = jnp.exp(s)
    # Softmax denominator on the EUP reciprocal slot (essentially free).
    p = e * pl.reciprocal(jnp.sum(e, axis=-1, keepdims=True), approx=True)
    ctx = jnp.einsum("hqk,khd->qhd", p, vh,
                     preferred_element_type=jnp.float32)             # (S, H, d_k)
    attn = ctx.reshape(S, D)

    # fc_out + residual + norm1
    logits = jnp.dot(attn, wo_ref[...], preferred_element_type=jnp.float32) + bo_ref[...]
    x1 = layernorm(logits + x, g1_ref, be1_ref)

    # feed-forward + residual + norm2
    h1 = jnp.maximum(
        jnp.dot(x1, w1_ref[...], preferred_element_type=jnp.float32) + b1_ref[...], 0.0)
    ff = jnp.dot(h1, w2_ref[...], preferred_element_type=jnp.float32) + b2_ref[...]
    out = layernorm(ff + x1, g2_ref, be2_ref)

    # Carry to the next layer; emit only after the last layer of this batch row.
    act_ref[...] = out

    @pl.when(l == pl.num_programs(1) - 1)
    def _():
        o_ref[...] = out.astype(o_ref.dtype)


# ----------------------------- wrapper ---------------------------------------
@functools.partial(jax.jit, static_argnames=("num_heads",))
def encoder_forward(x, params, num_heads):
    """Encoder.forward (mask=None): all layers fused into one pallas_call."""
    B, S, D = x.shape
    assert D % num_heads == 0, "embed_size must be divisible by num_heads"
    L = params["wqkv"].shape[0]
    d_ff = params["w1"].shape[-1]

    def wspec(shape):
        # Stacked param (L, *shape): fetch layer l's slab, squeeze the layer dim.
        zeros = (0,) * len(shape)
        return pl.BlockSpec((pl.Squeezed(),) + tuple(shape),
                            lambda b, l, _z=zeros: (l,) + _z)

    grid_spec = pltpu.PrefetchScalarGridSpec(
        num_scalar_prefetch=0,
        grid=(B, L),                           # batch parallel (v7x 2 TCs), layers sequential
        in_specs=[
            pl.BlockSpec((pl.Squeezed(), S, D), lambda b, l: (b, 0, 0)),   # x
            wspec((3, D, D)),                  # wqkv
            wspec((3, 1, D)),                  # bqkv
            wspec((D, D)),                     # wo
            wspec((1, D)),                     # bo
            wspec((1, D)),                     # g1
            wspec((1, D)),                     # be1
            wspec((D, d_ff)),                  # w1
            wspec((1, d_ff)),                  # b1
            wspec((d_ff, D)),                  # w2
            wspec((1, D)),                     # b2
            wspec((1, D)),                     # g2
            wspec((1, D)),                     # be2
        ],
        out_specs=pl.BlockSpec((pl.Squeezed(), S, D), lambda b, l: (b, 0, 0)),
        scratch_shapes=[pltpu.VMEM((S, D), jnp.float32)],   # resident activation carry
    )

    kernel = functools.partial(_encoder_kernel, num_heads=num_heads)
    return pl.pallas_call(
        kernel,
        out_shape=jax.ShapeDtypeStruct((B, S, D), x.dtype),
        grid_spec=grid_spec,
        compiler_params=pltpu.CompilerParams(
            dimension_semantics=("parallel", "arbitrary")),
    )(x, *[params[n] for n in _PARAM_ORDER])


# ----------------------------- parameter init --------------------------------
def init_linear(key, d_in, d_out):
    # torch nn.Linear default: U(-1/sqrt(in), 1/sqrt(in)) for weight and bias.
    kw, kb = jax.random.split(key)
    bound = 1.0 / math.sqrt(d_in)
    w = jax.random.uniform(kw, (d_in, d_out), jnp.float32, -bound, bound)
    b = jax.random.uniform(kb, (1, d_out), jnp.float32, -bound, bound)
    return w, b


def init_layer_params(key, d_model, forward_expansion):
    keys = jax.random.split(key, 6)
    d_ff = d_model * forward_expansion
    wq, bq = init_linear(keys[0], d_model, d_model)
    wk, bk = init_linear(keys[1], d_model, d_model)
    wv, bv = init_linear(keys[2], d_model, d_model)
    wo, bo = init_linear(keys[3], d_model, d_model)
    w1, b1 = init_linear(keys[4], d_model, d_ff)
    w2, b2 = init_linear(keys[5], d_ff, d_model)
    return {
        "wqkv": jnp.stack([wq, wk, wv]),       # (3, D, D): lane-aligned q/k/v slabs
        "bqkv": jnp.stack([bq, bk, bv]),       # (3, 1, D)
        "wo": wo, "bo": bo,
        "g1": jnp.ones((1, d_model), jnp.float32),
        "be1": jnp.zeros((1, d_model), jnp.float32),
        "w1": w1, "b1": b1, "w2": w2, "b2": b2,
        "g2": jnp.ones((1, d_model), jnp.float32),
        "be2": jnp.zeros((1, d_model), jnp.float32),
    }


def init_encoder_params(key, num_layers, d_model, forward_expansion):
    """Stack every per-layer param with a leading L axis (for the fused grid)."""
    keys = jax.random.split(key, num_layers)
    per_layer = [init_layer_params(k, d_model, forward_expansion) for k in keys]
    return {name: jnp.stack([p[name] for p in per_layer]) for name in _PARAM_ORDER}


# ----------------------------- pure-JAX reference ----------------------------
def _ref_block(x, p, num_heads):
    B, S, D = x.shape
    d_k = D // num_heads
    eps = 1e-6

    def lin(t, w, b):
        return t @ w + b

    def ln(t, g, b):
        mean = t.mean(-1, keepdims=True)
        var = ((t - mean) ** 2).sum(-1, keepdims=True) / (D - 1)
        return g * (t - mean) / (jnp.sqrt(var) + eps) + b

    q = lin(x, p["wqkv"][0], p["bqkv"][0]).reshape(B, S, num_heads, d_k).transpose(0, 2, 1, 3)
    k = lin(x, p["wqkv"][1], p["bqkv"][1]).reshape(B, S, num_heads, d_k).transpose(0, 2, 1, 3)
    v = lin(x, p["wqkv"][2], p["bqkv"][2]).reshape(B, S, num_heads, d_k).transpose(0, 2, 1, 3)
    scores = jnp.einsum("bhqd,bhkd->bhqk", q, k) / math.sqrt(d_k)
    attn = jax.nn.softmax(scores, axis=-1)
    o = jnp.einsum("bhqk,bhkd->bhqd", attn, v).transpose(0, 2, 1, 3).reshape(B, S, D)
    logits = lin(o, p["wo"], p["bo"])
    x1 = ln(logits + x, p["g1"], p["be1"])
    ff = lin(jnp.maximum(lin(x1, p["w1"], p["b1"]), 0.0), p["w2"], p["b2"])
    return ln(ff + x1, p["g2"], p["be2"])


def _ref_encoder(x, stacked_params, num_heads):
    L = stacked_params["wqkv"].shape[0]
    for l in range(L):
        p = {k: v[l] for k, v in stacked_params.items()}
        x = _ref_block(x, p, num_heads)
    return x


# ----------------------------------- main -------------------------------------
if __name__ == "__main__":
    embed_size = 32
    num_layers = 2
    heads = 4
    forward_expansion = 2
    B, S = 2, 8

    key = jax.random.PRNGKey(0)
    kx, kp = jax.random.split(key)

    x = jax.random.normal(kx, (B, S, embed_size), jnp.float32)
    params = init_encoder_params(kp, num_layers, embed_size, forward_expansion)

    out = jax.block_until_ready(encoder_forward(x, params, num_heads=heads))

    ref = _ref_encoder(x, params, heads)
    assert out.shape == (B, S, embed_size)
    # Softmax uses the EUP approximate reciprocal (per perf review), so allow a
    # slightly looser tolerance than the exact-reciprocal variant (which met 1e-4).
    assert jnp.allclose(out, ref, atol=2e-3, rtol=2e-3), "mismatch vs pure-JAX reference"

    print("KERNEL_OK")
</pallas_src>

<mosaic_0001>
module attributes {stable_mosaic.version = 11 : i64} {
  func.func @_encoder_kernel(%arg0: i32, %arg1: i32, %arg2: memref<1x8x32xf32, #tpu.memory_space<vmem>>, %arg3: memref<1x3x32x32xf32, #tpu.memory_space<vmem>>, %arg4: memref<1x3x1x32xf32, #tpu.memory_space<vmem>>, %arg5: memref<1x32x32xf32, #tpu.memory_space<vmem>>, %arg6: memref<1x1x32xf32, #tpu.memory_space<vmem>>, %arg7: memref<1x1x32xf32, #tpu.memory_space<vmem>>, %arg8: memref<1x1x32xf32, #tpu.memory_space<vmem>>, %arg9: memref<1x32x64xf32, #tpu.memory_space<vmem>>, %arg10: memref<1x1x64xf32, #tpu.memory_space<vmem>>, %arg11: memref<1x64x32xf32, #tpu.memory_space<vmem>>, %arg12: memref<1x1x32xf32, #tpu.memory_space<vmem>>, %arg13: memref<1x1x32xf32, #tpu.memory_space<vmem>>, %arg14: memref<1x1x32xf32, #tpu.memory_space<vmem>>, %arg15: memref<1x8x32xf32, #tpu.memory_space<vmem>>, %arg16: memref<8x32xf32, #tpu.memory_space<vmem>>) attributes {dimension_semantics = [#tpu.dimension_semantics<parallel>, #tpu.dimension_semantics<arbitrary>], iteration_bounds = array<i64: 2, 2>, scalar_prefetch = 0 : i64, scratch_operands = 1 : i64, tpu.core_type = #tpu.core_type<tc>, window_params = [{transform_indices = @transform_0, window_bounds = array<i64: 1, 8, 32>}, {transform_indices = @transform_1, window_bounds = array<i64: 1, 3, 32, 32>}, {transform_indices = @transform_2, window_bounds = array<i64: 1, 3, 1, 32>}, {transform_indices = @transform_3, window_bounds = array<i64: 1, 32, 32>}, {transform_indices = @transform_4, window_bounds = array<i64: 1, 1, 32>}, {transform_indices = @transform_5, window_bounds = array<i64: 1, 1, 32>}, {transform_indices = @transform_6, window_bounds = array<i64: 1, 1, 32>}, {transform_indices = @transform_7, window_bounds = array<i64: 1, 32, 64>}, {transform_indices = @transform_8, window_bounds = array<i64: 1, 1, 64>}, {transform_indices = @transform_9, window_bounds = array<i64: 1, 64, 32>}, {transform_indices = @transform_10, window_bounds = array<i64: 1, 1, 32>}, {transform_indices = @transform_11, window_bounds = array<i64: 1, 1, 32>}, {transform_indices = @transform_12, window_bounds = array<i64: 1, 1, 32>}, {transform_indices = @transform_13, window_bounds = array<i64: 1, 8, 32>}]} {
    %c0_i32 = arith.constant 0 : i32
    %0 = arith.cmpi eq, %arg1, %c0_i32 : i32
    %1 = arith.extui %0 : i1 to i32
    %c0_i32_0 = arith.constant 0 : i32
    %2 = arith.cmpi ne, %1, %c0_i32_0 : i32
    scf.if %2 {
      %c0_78 = arith.constant 0 : index
      %c0_79 = arith.constant 0 : index
      %c0_80 = arith.constant 0 : index
      %123 = vector.load %arg2[%c0_78, %c0_79, %c0_80] : memref<1x8x32xf32, #tpu.memory_space<vmem>>, vector<1x8x32xf32>
      %124 = vector.shape_cast %123 : vector<1x8x32xf32> to vector<8x32xf32>
      %c0_81 = arith.constant 0 : index
      %c0_82 = arith.constant 0 : index
      %125 = vector.load %arg16[%c0_81, %c0_82] : memref<8x32xf32, #tpu.memory_space<vmem>>, vector<8x32xf32>
      tpu.vector_store %arg16[%c0_81, %c0_82], %124 {strides = array<i32>} : memref<8x32xf32, #tpu.memory_space<vmem>>, vector<8x32xf32>,
    } else {
    }
    %c0 = arith.constant 0 : index
    %c0_1 = arith.constant 0 : index
    %3 = vector.load %arg16[%c0, %c0_1] : memref<8x32xf32, #tpu.memory_space<vmem>>, vector<8x32xf32>
    %c0_2 = arith.constant 0 : index
    %c0_3 = arith.constant 0 : index
    %c0_4 = arith.constant 0 : index
    %c0_5 = arith.constant 0 : index
    %4 = vector.load %arg3[%c0_2, %c0_3, %c0_4, %c0_5] : memref<1x3x32x32xf32, #tpu.memory_space<vmem>>, vector<1x1x32x32xf32>
    %5 = vector.shape_cast %4 : vector<1x1x32x32xf32> to vector<32x32xf32>
    %cst = arith.constant dense<0.000000e+00> : vector<8x32xf32>
    %6 = tpu.matmul %3, %5, %cst {dimension_numbers = #tpu.dot_dimension_numbers<[1], [0], [0], [1], [0, 0, 1, 1], [], []>} : vector<8x32xf32>, vector<32x32xf32>, vector<8x32xf32> -> vector<8x32xf32>
    %c0_6 = arith.constant 0 : index
    %c0_7 = arith.constant 0 : index
    %c0_8 = arith.constant 0 : index
    %c0_9 = arith.constant 0 : index
    %7 = vector.load %arg4[%c0_6, %c0_7, %c0_8, %c0_9] : memref<1x3x1x32xf32, #tpu.memory_space<vmem>>, vector<1x1x1x32xf32>
    %8 = vector.shape_cast %7 : vector<1x1x1x32xf32> to vector<1x32xf32>
    %9 = vector.broadcast %8 : vector<1x32xf32> to vector<8x32xf32>
    %10 = arith.addf %6, %9 : vector<8x32xf32>
    %c0_10 = arith.constant 0 : index
    %c1 = arith.constant 1 : index
    %c0_11 = arith.constant 0 : index
    %c0_12 = arith.constant 0 : index
    %11 = vector.load %arg3[%c0_10, %c1, %c0_11, %c0_12] : memref<1x3x32x32xf32, #tpu.memory_space<vmem>>, vector<1x1x32x32xf32>
    %12 = vector.shape_cast %11 : vector<1x1x32x32xf32> to vector<32x32xf32>
    %cst_13 = arith.constant dense<0.000000e+00> : vector<8x32xf32>
    %13 = tpu.matmul %3, %12, %cst_13 {dimension_numbers = #tpu.dot_dimension_numbers<[1], [0], [0], [1], [0, 0, 1, 1], [], []>} : vector<8x32xf32>, vector<32x32xf32>, vector<8x32xf32> -> vector<8x32xf32>
    %c0_14 = arith.constant 0 : index
    %c1_15 = arith.constant 1 : index
    %c0_16 = arith.constant 0 : index
    %c0_17 = arith.constant 0 : index
    %14 = vector.load %arg4[%c0_14, %c1_15, %c0_16, %c0_17] : memref<1x3x1x32xf32, #tpu.memory_space<vmem>>, vector<1x1x1x32xf32>
    %15 = vector.shape_cast %14 : vector<1x1x1x32xf32> to vector<1x32xf32>
    %16 = vector.broadcast %15 : vector<1x32xf32> to vector<8x32xf32>
    %17 = arith.addf %13, %16 : vector<8x32xf32>
    %c0_18 = arith.constant 0 : index
    %c2 = arith.constant 2 : index
    %c0_19 = arith.constant 0 : index
    %c0_20 = arith.constant 0 : index
    %18 = vector.load %arg3[%c0_18, %c2, %c0_19, %c0_20] : memref<1x3x32x32xf32, #tpu.memory_space<vmem>>, vector<1x1x32x32xf32>
    %19 = vector.shape_cast %18 : vector<1x1x32x32xf32> to vector<32x32xf32>
    %cst_21 = arith.constant dense<0.000000e+00> : vector<8x32xf32>
    %20 = tpu.matmul %3, %19, %cst_21 {dimension_numbers = #tpu.dot_dimension_numbers<[1], [0], [0], [1], [0, 0, 1, 1], [], []>} : vector<8x32xf32>, vector<32x32xf32>, vector<8x32xf32> -> vector<8x32xf32>
    %c0_22 = arith.constant 0 : index
    %c2_23 = arith.constant 2 : index
    %c0_24 = arith.constant 0 : index
    %c0_25 = arith.constant 0 : index
    %21 = vector.load %arg4[%c0_22, %c2_23, %c0_24, %c0_25] : memref<1x3x1x32xf32, #tpu.memory_space<vmem>>, vector<1x1x1x32xf32>
    %22 = vector.shape_cast %21 : vector<1x1x1x32xf32> to vector<1x32xf32>
    %23 = vector.broadcast %22 : vector<1x32xf32> to vector<8x32xf32>
    %24 = arith.addf %20, %23 : vector<8x32xf32>
    %25 = vector.shape_cast %10 : vector<8x32xf32> to vector<8x4x8xf32>
    %26 = vector.shape_cast %17 : vector<8x32xf32> to vector<8x4x8xf32>
    %27 = vector.shape_cast %24 : vector<8x32xf32> to vector<8x4x8xf32>
    "tpu.trace_start"() <{level = 10 : i32, message = "qhd,khd->hqk"}> : () -> ()
    %cst_26 = arith.constant dense<0.000000e+00> : vector<4x8x8xf32>
    %28 = tpu.matmul %25, %26, %cst_26 {dimension_numbers = #tpu.dot_dimension_numbers<[2], [2], [0], [0], [0, 1, 0, 0, 1, 0], [1], [1]>} : vector<8x4x8xf32>, vector<8x4x8xf32>, vector<4x8x8xf32> -> vector<4x8x8xf32>
    "tpu.trace_stop"() : () -> ()
    %cst_27 = arith.constant 0.353553385 : f32
    %29 = vector.broadcast %cst_27 : f32 to vector<4x8x8xf32>
    %30 = arith.mulf %28, %29 : vector<4x8x8xf32>
    %cst_28 = arith.constant dense<0xFF800000> : vector<4x8xf32>
    %31 = vector.multi_reduction <maximumf>, %30, %cst_28 [2] : vector<4x8x8xf32> to vector<4x8xf32>
    %32 = vector.shape_cast %31 : vector<4x8xf32> to vector<4x8x1xf32>
    %33 = vector.broadcast %32 : vector<4x8x1xf32> to vector<4x8x8xf32>
    %34 = arith.subf %30, %33 : vector<4x8x8xf32>
    %35 = math.exp %34 : vector<4x8x8xf32>
    %cst_29 = arith.constant dense<0.000000e+00> : vector<4x8xf32>
    %36 = vector.multi_reduction <add>, %35, %cst_29 [2] : vector<4x8x8xf32> to vector<4x8xf32>
    %37 = vector.shape_cast %36 : vector<4x8xf32> to vector<4x8x1xf32>
    %38 = tpu.reciprocal %37 {approx = true} : vector<4x8x1xf32> -> vector<4x8x1xf32>
    %39 = vector.broadcast %38 : vector<4x8x1xf32> to vector<4x8x8xf32>
    %40 = arith.mulf %35, %39 : vector<4x8x8xf32>
    "tpu.trace_start"() <{level = 10 : i32, message = "hqk,khd->qhd"}> : () -> ()
    %cst_30 = arith.constant dense<0.000000e+00> : vector<4x8x8xf32>
    %41 = tpu.matmul %27, %40, %cst_30 {dimension_numbers = #tpu.dot_dimension_numbers<[0], [2], [2], [1], [0, 1, 0, 2, 1, 1], [1], [0]>} : vector<8x4x8xf32>, vector<4x8x8xf32>, vector<4x8x8xf32> -> vector<4x8x8xf32>
    %42 = tpu.transpose %41, [2, 0, 1] : vector<4x8x8xf32> -> vector<8x4x8xf32>
    "tpu.trace_stop"() : () -> ()
    %43 = vector.shape_cast %42 : vector<8x4x8xf32> to vector<8x32xf32>
    %c0_31 = arith.constant 0 : index
    %c0_32 = arith.constant 0 : index
    %c0_33 = arith.constant 0 : index
    %44 = vector.load %arg5[%c0_31, %c0_32, %c0_33] : memref<1x32x32xf32, #tpu.memory_space<vmem>>, vector<1x32x32xf32>
    %45 = vector.shape_cast %44 : vector<1x32x32xf32> to vector<32x32xf32>
    %cst_34 = arith.constant dense<0.000000e+00> : vector<8x32xf32>
    %46 = tpu.matmul %43, %45, %cst_34 {dimension_numbers = #tpu.dot_dimension_numbers<[1], [0], [0], [1], [0, 0, 1, 1], [], []>} : vector<8x32xf32>, vector<32x32xf32>, vector<8x32xf32> -> vector<8x32xf32>
    %c0_35 = arith.constant 0 : index
    %c0_36 = arith.constant 0 : index
    %c0_37 = arith.constant 0 : index
    %47 = vector.load %arg6[%c0_35, %c0_36, %c0_37] : memref<1x1x32xf32, #tpu.memory_space<vmem>>, vector<1x1x32xf32>
    %48 = vector.shape_cast %47 : vector<1x1x32xf32> to vector<1x32xf32>
    %49 = vector.broadcast %48 : vector<1x32xf32> to vector<8x32xf32>
    %50 = arith.addf %46, %49 : vector<8x32xf32>
    %51 = arith.addf %50, %3 : vector<8x32xf32>
    %cst_38 = arith.constant dense<0.000000e+00> : vector<8xf32>
    %52 = vector.multi_reduction <add>, %51, %cst_38 [1] : vector<8x32xf32> to vector<8xf32>
    %53 = vector.shape_cast %52 : vector<8xf32> to vector<8x1xf32>
    %cst_39 = arith.constant 3.125000e-02 : f32
    %54 = vector.broadcast %cst_39 : f32 to vector<8x1xf32>
    %55 = arith.mulf %53, %54 : vector<8x1xf32>
    %56 = vector.broadcast %55 : vector<8x1xf32> to vector<8x32xf32>
    %57 = arith.subf %51, %56 : vector<8x32xf32>
    %58 = arith.mulf %57, %57 : vector<8x32xf32>
    %cst_40 = arith.constant dense<0.000000e+00> : vector<8xf32>
    %59 = vector.multi_reduction <add>, %58, %cst_40 [1] : vector<8x32xf32> to vector<8xf32>
    %60 = vector.shape_cast %59 : vector<8xf32> to vector<8x1xf32>
    %cst_41 = arith.constant 0.0322580636 : f32
    %61 = vector.broadcast %cst_41 : f32 to vector<8x1xf32>
    %62 = arith.mulf %60, %61 : vector<8x1xf32>
    %63 = math.sqrt %62 : vector<8x1xf32>
    %cst_42 = arith.constant 9.99999997E-7 : f32
    %64 = vector.broadcast %cst_42 : f32 to vector<8x1xf32>
    %65 = arith.addf %63, %64 : vector<8x1xf32>
    %66 = tpu.reciprocal %65 : vector<8x1xf32> -> vector<8x1xf32>
    %c0_43 = arith.constant 0 : index
    %c0_44 = arith.constant 0 : index
    %c0_45 = arith.constant 0 : index
    %67 = vector.load %arg7[%c0_43, %c0_44, %c0_45] : memref<1x1x32xf32, #tpu.memory_space<vmem>>, vector<1x1x32xf32>
    %68 = vector.shape_cast %67 : vector<1x1x32xf32> to vector<1x32xf32>
    %69 = vector.broadcast %68 : vector<1x32xf32> to vector<8x32xf32>
    %70 = arith.mulf %69, %57 : vector<8x32xf32>
    %71 = vector.broadcast %66 : vector<8x1xf32> to vector<8x32xf32>
    %72 = arith.mulf %70, %71 : vector<8x32xf32>
    %c0_46 = arith.constant 0 : index
    %c0_47 = arith.constant 0 : index
    %c0_48 = arith.constant 0 : index
    %73 = vector.load %arg8[%c0_46, %c0_47, %c0_48] : memref<1x1x32xf32, #tpu.memory_space<vmem>>, vector<1x1x32xf32>
    %74 = vector.shape_cast %73 : vector<1x1x32xf32> to vector<1x32xf32>
    %75 = vector.broadcast %74 : vector<1x32xf32> to vector<8x32xf32>
    %76 = arith.addf %72, %75 : vector<8x32xf32>
    %c0_49 = arith.constant 0 : index
    %c0_50 = arith.constant 0 : index
    %c0_51 = arith.constant 0 : index
    %77 = vector.load %arg9[%c0_49, %c0_50, %c0_51] : memref<1x32x64xf32, #tpu.memory_space<vmem>>, vector<1x32x64xf32>
    %78 = vector.shape_cast %77 : vector<1x32x64xf32> to vector<32x64xf32>
    %cst_52 = arith.constant dense<0.000000e+00> : vector<8x64xf32>
    %79 = tpu.matmul %76, %78, %cst_52 {dimension_numbers = #tpu.dot_dimension_numbers<[1], [0], [0], [1], [0, 0, 1, 1], [], []>} : vector<8x32xf32>, vector<32x64xf32>, vector<8x64xf32> -> vector<8x64xf32>
    %c0_53 = arith.constant 0 : index
    %c0_54 = arith.constant 0 : index
    %c0_55 = arith.constant 0 : index
    %80 = vector.load %arg10[%c0_53, %c0_54, %c0_55] : memref<1x1x64xf32, #tpu.memory_space<vmem>>, vector<1x1x64xf32>
    %81 = vector.shape_cast %80 : vector<1x1x64xf32> to vector<1x64xf32>
    %82 = vector.broadcast %81 : vector<1x64xf32> to vector<8x64xf32>
    %83 = arith.addf %79, %82 : vector<8x64xf32>
    %cst_56 = arith.constant 0.000000e+00 : f32
    %84 = vector.broadcast %cst_56 : f32 to vector<8x64xf32>
    %85 = arith.maximumf %83, %84 : vector<8x64xf32>
    %c0_57 = arith.constant 0 : index
    %c0_58 = arith.constant 0 : index
    %c0_59 = arith.constant 0 : index
    %86 = vector.load %arg11[%c0_57, %c0_58, %c0_59] : memref<1x64x32xf32, #tpu.memory_space<vmem>>, vector<1x64x32xf32>
    %87 = vector.shape_cast %86 : vector<1x64x32xf32> to vector<64x32xf32>
    %cst_60 = arith.constant dense<0.000000e+00> : vector<8x32xf32>
    %88 = tpu.matmul %85, %87, %cst_60 {dimension_numbers = #tpu.dot_dimension_numbers<[1], [0], [0], [1], [0, 0, 1, 1], [], []>} : vector<8x64xf32>, vector<64x32xf32>, vector<8x32xf32> -> vector<8x32xf32>
    %c0_61 = arith.constant 0 : index
    %c0_62 = arith.constant 0 : index
    %c0_63 = arith.constant 0 : index
    %89 = vector.load %arg12[%c0_61, %c0_62, %c0_63] : memref<1x1x32xf32, #tpu.memory_space<vmem>>, vector<1x1x32xf32>
    %90 = vector.shape_cast %89 : vector<1x1x32xf32> to vector<1x32xf32>
    %91 = vector.broadcast %90 : vector<1x32xf32> to vector<8x32xf32>
    %92 = arith.addf %88, %91 : vector<8x32xf32>
    %93 = arith.addf %92, %76 : vector<8x32xf32>
    %cst_64 = arith.constant dense<0.000000e+00> : vector<8xf32>
    %94 = vector.multi_reduction <add>, %93, %cst_64 [1] : vector<8x32xf32> to vector<8xf32>
    %95 = vector.shape_cast %94 : vector<8xf32> to vector<8x1xf32>
    %cst_65 = arith.constant 3.125000e-02 : f32
    %96 = vector.broadcast %cst_65 : f32 to vector<8x1xf32>
    %97 = arith.mulf %95, %96 : vector<8x1xf32>
    %98 = vector.broadcast %97 : vector<8x1xf32> to vector<8x32xf32>
    %99 = arith.subf %93, %98 : vector<8x32xf32>
    %100 = arith.mulf %99, %99 : vector<8x32xf32>
    %cst_66 = arith.constant dense<0.000000e+00> : vector<8xf32>
    %101 = vector.multi_reduction <add>, %100, %cst_66 [1] : vector<8x32xf32> to vector<8xf32>
    %102 = vector.shape_cast %101 : vector<8xf32> to vector<8x1xf32>
    %cst_67 = arith.constant 0.0322580636 : f32
    %103 = vector.broadcast %cst_67 : f32 to vector<8x1xf32>
    %104 = arith.mulf %102, %103 : vector<8x1xf32>
    %105 = math.sqrt %104 : vector<8x1xf32>
    %cst_68 = arith.constant 9.99999997E-7 : f32
    %106 = vector.broadcast %cst_68 : f32 to vector<8x1xf32>
    %107 = arith.addf %105, %106 : vector<8x1xf32>
    %108 = tpu.reciprocal %107 : vector<8x1xf32> -> vector<8x1xf32>
    %c0_69 = arith.constant 0 : index
    %c0_70 = arith.constant 0 : index
    %c0_71 = arith.constant 0 : index
    %109 = vector.load %arg13[%c0_69, %c0_70, %c0_71] : memref<1x1x32xf32, #tpu.memory_space<vmem>>, vector<1x1x32xf32>
    %110 = vector.shape_cast %109 : vector<1x1x32xf32> to vector<1x32xf32>
    %111 = vector.broadcast %110 : vector<1x32xf32> to vector<8x32xf32>
    %112 = arith.mulf %111, %99 : vector<8x32xf32>
    %113 = vector.broadcast %108 : vector<8x1xf32> to vector<8x32xf32>
    %114 = arith.mulf %112, %113 : vector<8x32xf32>
    %c0_72 = arith.constant 0 : index
    %c0_73 = arith.constant 0 : index
    %c0_74 = arith.constant 0 : index
    %115 = vector.load %arg14[%c0_72, %c0_73, %c0_74] : memref<1x1x32xf32, #tpu.memory_space<vmem>>, vector<1x1x32xf32>
    %116 = vector.shape_cast %115 : vector<1x1x32xf32> to vector<1x32xf32>
    %117 = vector.broadcast %116 : vector<1x32xf32> to vector<8x32xf32>
    %118 = arith.addf %114, %117 : vector<8x32xf32>
    %c0_75 = arith.constant 0 : index
    %c0_76 = arith.constant 0 : index
    %119 = vector.load %arg16[%c0_75, %c0_76] : memref<8x32xf32, #tpu.memory_space<vmem>>, vector<8x32xf32>
    tpu.vector_store %arg16[%c0_75, %c0_76], %118 {strides = array<i32>} : memref<8x32xf32, #tpu.memory_space<vmem>>, vector<8x32xf32>,
    %c1_i32 = arith.constant 1 : i32
    %120 = arith.cmpi eq, %arg1, %c1_i32 : i32
    %121 = arith.extui %120 : i1 to i32
    %c0_i32_77 = arith.constant 0 : i32
    %122 = arith.cmpi ne, %121, %c0_i32_77 : i32
    scf.if %122 {
      %c0_78 = arith.constant 0 : index
      %c0_79 = arith.constant 0 : index
      %c0_80 = arith.constant 0 : index
      %123 = vector.load %arg15[%c0_78, %c0_79, %c0_80] : memref<1x8x32xf32, #tpu.memory_space<vmem>>, vector<1x8x32xf32>
      %124 = vector.shape_cast %123 : vector<1x8x32xf32> to vector<8x32xf32>
      %125 = vector.shape_cast %118 : vector<8x32xf32> to vector<1x8x32xf32>
      tpu.vector_store %arg15[%c0_78, %c0_79, %c0_80], %125 {strides = array<i32>} : memref<1x8x32xf32, #tpu.memory_space<vmem>>, vector<1x8x32xf32>,
    } else {
    }
    return
  }
  func.func @transform_0(%arg0: i32, %arg1: i32) -> (i32, i32, i32) {
    %c0_i32 = arith.constant 0 : i32
    %c0_i32_0 = arith.constant 0 : i32
    %c0_i32_1 = arith.constant 0 : i32
    return %arg0, %c0_i32, %c0_i32_0 : i32, i32, i32
  }
  func.func @transform_1(%arg0: i32, %arg1: i32) -> (i32, i32, i32, i32) {
    %c0_i32 = arith.constant 0 : i32
    %c0_i32_0 = arith.constant 0 : i32
    %c0_i32_1 = arith.constant 0 : i32
    %c0_i32_2 = arith.constant 0 : i32
    return %arg1, %c0_i32, %c0_i32_0, %c0_i32_1 : i32, i32, i32, i32
  }
  func.func @transform_2(%arg0: i32, %arg1: i32) -> (i32, i32, i32, i32) {
    %c0_i32 = arith.constant 0 : i32
    %c0_i32_0 = arith.constant 0 : i32
    %c0_i32_1 = arith.constant 0 : i32
    %c0_i32_2 = arith.constant 0 : i32
    return %arg1, %c0_i32, %c0_i32_0, %c0_i32_1 : i32, i32, i32, i32
  }
  func.func @transform_3(%arg0: i32, %arg1: i32) -> (i32, i32, i32) {
    %c0_i32 = arith.constant 0 : i32
    %c0_i32_0 = arith.constant 0 : i32
    %c0_i32_1 = arith.constant 0 : i32
    return %arg1, %c0_i32, %c0_i32_0 : i32, i32, i32
  }
  func.func @transform_4(%arg0: i32, %arg1: i32) -> (i32, i32, i32) {
    %c0_i32 = arith.constant 0 : i32
    %c0_i32_0 = arith.constant 0 : i32
    %c0_i32_1 = arith.constant 0 : i32
    return %arg1, %c0_i32, %c0_i32_0 : i32, i32, i32
  }
  func.func @transform_5(%arg0: i32, %arg1: i32) -> (i32, i32, i32) {
    %c0_i32 = arith.constant 0 : i32
    %c0_i32_0 = arith.constant 0 : i32
    %c0_i32_1 = arith.constant 0 : i32
    return %arg1, %c0_i32, %c0_i32_0 : i32, i32, i32
  }
  func.func @transform_6(%arg0: i32, %arg1: i32) -> (i32, i32, i32) {
    %c0_i32 = arith.constant 0 : i32
    %c0_i32_0 = arith.constant 0 : i32
    %c0_i32_1 = arith.constant 0 : i32
    return %arg1, %c0_i32, %c0_i32_0 : i32, i32, i32
  }
  func.func @transform_7(%arg0: i32, %arg1: i32) -> (i32, i32, i32) {
    %c0_i32 = arith.constant 0 : i32
    %c0_i32_0 = arith.constant 0 : i32
    %c0_i32_1 = arith.constant 0 : i32
    return %arg1, %c0_i32, %c0_i32_0 : i32, i32, i32
  }
  func.func @transform_8(%arg0: i32, %arg1: i32) -> (i32, i32, i32) {
    %c0_i32 = arith.constant 0 : i32
    %c0_i32_0 = arith.constant 0 : i32
    %c0_i32_1 = arith.constant 0 : i32
    return %arg1, %c0_i32, %c0_i32_0 : i32, i32, i32
  }
  func.func @transform_9(%arg0: i32, %arg1: i32) -> (i32, i32, i32) {
    %c0_i32 = arith.constant 0 : i32
    %c0_i32_0 = arith.constant 0 : i32
    %c0_i32_1 = arith.constant 0 : i32
    return %arg1, %c0_i32, %c0_i32_0 : i32, i32, i32
  }
  func.func @transform_10(%arg0: i32, %arg1: i32) -> (i32, i32, i32) {
    %c0_i32 = arith.constant 0 : i32
    %c0_i32_0 = arith.constant 0 : i32
    %c0_i32_1 = arith.constant 0 : i32
    return %arg1, %c0_i32, %c0_i32_0 : i32, i32, i32
  }
  func.func @transform_11(%arg0: i32, %arg1: i32) -> (i32, i32, i32) {
    %c0_i32 = arith.constant 0 : i32
    %c0_i32_0 = arith.constant 0 : i32
    %c0_i32_1 = arith.constant 0 : i32
    return %arg1, %c0_i32, %c0_i32_0 : i32, i32, i32
  }
  func.func @transform_12(%arg0: i32, %arg1: i32) -> (i32, i32, i32) {
    %c0_i32 = arith.constant 0 : i32
    %c0_i32_0 = arith.constant 0 : i32
    %c0_i32_1 = arith.constant 0 : i32
    return %arg1, %c0_i32, %c0_i32_0 : i32, i32, i32
  }
  func.func @transform_13(%arg0: i32, %arg1: i32) -> (i32, i32, i32) {
    %c0_i32 = arith.constant 0 : i32
    %c0_i32_0 = arith.constant 0 : i32
    %c0_i32_1 = arith.constant 0 : i32
    return %arg0, %c0_i32, %c0_i32_0 : i32, i32, i32
  }
}

</mosaic_0001>

<bundles_post_ra>
// kernel: encoder_forward.1
= control target key start
LH: loop header
LB: loop body
LE: loop exit
PB: predicated region body
PF: predicated region fallthrough
CT: control target
= control target key end

     0   :  { %s4293_s0 = inlined_call_operand.vmem [shape: f32[2,8,32], index: 0, kind: input, shape index: {}]   ;;  %s4294_s1 = inlined_call_operand.vmem [shape: f32[2,3,32,32], index: 1, kind: input, shape index: {}]   ;;  %s4295_s2 = inlined_call_operand.hbm [shape: f32[2,3,1,32], index: 2, kind: input, shape index: {}]   ;;  %s4296_s3 = inlined_call_operand.hbm [shape: f32[2,32,32], index: 3, kind: input, shape index: {}]   ;;  %s4297_s4 = inlined_call_operand.vmem [shape: f32[2,1,32], index: 4, kind: input, shape index: {}]   ;;  %s4298_s5 = inlined_call_operand.vmem [shape: f32[2,1,32], index: 5, kind: input, shape index: {}]   ;;  %s4299_s6 = inlined_call_operand.hbm [shape: f32[2,1,32], index: 6, kind: input, shape index: {}]   ;;  %s4300_s7 = inlined_call_operand.hbm [shape: f32[2,32,64], index: 7, kind: input, shape index: {}]   ;;  %s4301_s8 = inlined_call_operand.hbm [shape: f32[2,1,64], index: 8, kind: input, shape index: {}]   ;;  %s4302_s9 = inlined_call_operand.vmem [shape: f32[2,64,32], index: 9, kind: input, shape index: {}]   ;;  %s4303_s10 = inlined_call_operand.hbm [shape: f32[2,1,32], index: 10, kind: input, shape index: {}]   ;;  %s4304_s11 = inlined_call_operand.hbm [shape: f32[2,1,32], index: 11, kind: input, shape index: {}]   ;;  %s4305_s12 = inlined_call_operand.hbm [shape: f32[2,1,32], index: 12, kind: input, shape index: {}]   ;;  %s4306_s13 = inlined_call_operand.hbm [shape: f32[2,8,32], index: 13, kind: output, shape index: {}]  }
   0x1   :  { %4328 = sst [smem:[#allocation39_spill]] %s4293_s0 }
   0x2   :  { %4329 = sst [smem:[#allocation40_spill]] %s4294_s1 }
   0x3   :  { %4330 = sst [smem:[#allocation41_spill]] %s4295_s2 }
   0x4   :  { %4331 = sst [smem:[#allocation42_spill]] %s4296_s3 }
   0x5   :  { %4332 = sst [smem:[#allocation43_spill]] %s4297_s4 }
   0x6   :  { %4333 = sst [smem:[#allocation44_spill]] %s4298_s5 }
   0x7   :  { %4334 = sst [smem:[#allocation45_spill]] %s4299_s6 }
   0x8   :  { %4335 = sst [smem:[#allocation46_spill]] %s4300_s7 }
   0x9   :  { %4336 = sst [smem:[#allocation47_spill]] %s4301_s8 }
   0xa   :  { %4337 = sst [smem:[#allocation48_spill]] %s4302_s9 }
   0xb   :  { %4338 = sst [smem:[#allocation49_spill]] %s4303_s10 }
   0xc   :  { %4339 = sst [smem:[#allocation50_spill]] %s4304_s11 }
   0xd   :  { %4340 = sst [smem:[#allocation51_spill]] %s4305_s12 }
   0xe   :  { %4341 = sst [smem:[#allocation52_spill]] %s4306_s13 }
   0xf   :  { %18 = vsyncpa [#allocation4], 0 }
  0x10   :  { %20 = vsyncpa [#allocation4 + $0x1], 0 }
  0x11   :  { %21 = vsyncpa [#allocation7], 0 }
  0x12   :  { %23 = vsyncpa [#allocation7 + $0x1], 0 }
  0x13   :  { %24 = vsyncpa [#allocation10], 0 }
  0x14   :  { %26 = vsyncpa [#allocation10 + $0x1], 0 }
  0x15   :  { %27 = vsyncpa [#allocation13], 0 }
  0x16   :  { %29 = vsyncpa [#allocation13 + $0x1], 0 }
  0x17   :  { %30 = vsyncpa [#allocation16], 0 }
  0x18   :  { %32 = vsyncpa [#allocation16 + $0x1], 0 }
  0x19   :  { %33 = vsyncpa [#allocation5], 0 }
  0x1a   :  { %35 = vsyncpa [#allocation5 + $0x1], 0  ;;  %s3756_s25 = smov 0   ;;  %s3758_s26 = smov 0  }
  0x1b   :  { %s3760_s27 = smov 0   ;;  %s3762_s28 = smov 0  }
  0x1c   :  { %s3764_s29 = smov 0   ;;  %s3766_s30 = smov 0  }
  0x1d   :  { %s3768_s14 = smov 0   ;;  %s3770_s15 = smov 0  }
  0x1e   :  { %s3772_s16 = smov 0   ;;  %s3774_s17 = smov 0  }
  0x1f   :  { %s3776_s18 = smov 0  }
  0x20 LB: > { %4342 = sst [smem:[#allocation24_spill]] %s3621_s25  ;;  %s3810_s19 = sadd.s32 4294967295, %s3661_s18   ;;  %s3661_s18 = sphi %s3776_s18, %s41_s18   ;;  %s3657_s17 = sphi %s3774_s17, %s4408_s17   ;;  %s3653_s16 = sphi %s3772_s16, %s4407_s16   ;;  %s3649_s15 = sphi %s3770_s15, %s4406_s15   ;;  %s3645_s14 = sphi %s3768_s14, %s4411_s14   ;;  %s3641_s30 = sphi %s3766_s30, %s4404_s30   ;;  %s3637_s29 = sphi %s3764_s29, %s4410_s29   ;;  %s3633_s28 = sphi %s3762_s28, %s4409_s28   ;;  %s3629_s27 = sphi %s3760_s27, %s4402_s27   ;;  %s3625_s26 = sphi %s3758_s26, %s4401_s26   ;;  %s3621_s25 = sphi %s3756_s25, %s4400_s25  }
  0x21   : > { %4343 = sst [smem:[#allocation25_spill]] %s3625_s26  ;;  %s2886_s20 = sadd.s32 4294967294, %s3661_s18  }
  0x22   : > { %4344 = sst [smem:[#allocation26_spill]] %s3629_s27  ;;  %s50_s21 = sadd.s32 1, %s3653_s16 }
  0x23   : > { %4345 = sst [smem:[#allocation27_spill]] %s3641_s30  ;;  %s53_s22 = sadd.s32 1, %s3657_s17 }
  0x24   : > { %4346 = sst [smem:[#allocation28_spill]] %s3645_s14  ;;  %p51_p0 = scmp.ge.s32.totalorder %s50_s21, 2 }
  0x25   : > { %4347 = sst [smem:[#allocation29_spill]] %s3649_s15  ;;  %s112_s23 = sadd.s32 1, %s3641_s30 }
  0x26   : > { %4348 = sst [smem:[#allocation30_spill]] %s3653_s16  ;;  %p119_p1 = scmp.ne.s32.totalorder %s3641_s30, %s3637_s29 }
  0x27   : > { %4349 = sst [smem:[#allocation31_spill]] %s3657_s17  ;;  %p120_p2 = scmp.eq.s32.totalorder %s3661_s18, 0 }
  0x28   : > { %4350 = sst [smem:[#allocation32_spill]] %s3810_s19  ;;  %s4413_s21 = smov (%p51_p0, %s50_s21), 0 }
  0x29   : > { %4351 = sst [smem:[#allocation33_spill]] %s4413_s21  ;;  %s4415_s22 = smov (!%p51_p0, %s53_s22), %s3657_s17 }
  0x2a   : > { %s109_s24 = ssub.s32 %s3653_s16, %s4413_s21  ;;  %p3824_p3 = por %p120_p2, %p119_p1 }
  0x2b   : > { %p55_p4 = scmp.ge.s32.totalorder %s4415_s22, 2  ;;  %p110_p5 = scmp.eq.s32.totalorder %s109_s24, 0 }
  0x2c   : > { %p125_p6 = scmp.ne.s32.totalorder %s3637_s29, %s3633_s28  ;;  %p126_p7 = scmp.eq.s32.totalorder %s3810_s19, 0 }
  0x2d   : > { %s4417_s22 = smov (%p55_p4, %s4415_s22), 0  ;;  %s398_s5 = sadd.s32 1, %s3629_s27 }
  0x2e   : > { %4353 = sst [smem:[#allocation34_spill]] %s4417_s22  ;;  %p3835_p8 = por %p126_p7, %p125_p6 }
  0x2f   : > { %s3833_s9 = scalar_select %p110_p5, %s3641_s30, %s112_s23  }
  0x30   : > { %s395_s1 = ssub.s32 %s3657_s17, %s4417_s22  ;;  %p408_p10 = scmp.ne.s32.totalorder %s3629_s27, %s3625_s26 }
  0x31   : > { %4354 = sst [smem:[#allocation35_spill]] %s3833_s9  ;;  %p396_p9 = scmp.eq.s32.totalorder %s395_s1, 0 }
  0x32   : > { %p409_p11 = scmp.eq.s32.totalorder %s3810_s19, 3  ;;  %p414_p13 = scmp.ne.s32.totalorder %s3625_s26, %s3621_s25 }
  0x33   : > { %s3846_s28 = scalar_select %p396_p9, %s3629_s27, %s398_s5  }
  0x34   : > { %p3848_p12 = por %p409_p11, %p408_p10  ;;  %p415_p0 = scmp.eq.s32.totalorder %s2886_s20, 3 }
  0x35   : > { %4356 = sst [smem:[#allocation36_spill]] %s3846_s28  ;;  %p3173_p1 = scmp.lt.s32.totalorder %s3661_s18, 4 }
  0x36   : > { %s4357_s24 = scalar_select %p3848_p12, 1, 0 }
  0x37   : > { %s3856_s23 = sand.u32 1, %s3641_s30   ;;  %p3858_p2 = por %p415_p0, %p414_p13 }
  0x38   : > { %4358 = sst [smem:[#allocation37_spill]] %s4357_s24  ;;  %s3863_s1 = sand.u32 1, %s3661_s18  }
  0x39   : > { %s4359_s22 = scalar_select %p3858_p2, 1, 0 }
  0x3a   : > { %p3867_p4 = pnand %p3173_p1, %p3824_p3  ;;  %s4317_s17 = sshll.u32 %s3856_s23, 5 }
  0x3b   : > { %4360 = sst [smem:[#allocation38_spill]] %s4359_s22  ;;  %s2955_s20 = sshll.u32 %s3653_s16, 9 }
  0x3c   : > { %s4362_s3 = sld [smem:[#allocation42_spill]]  ;;  %s475_s27 = scalar_lea.vmem [#allocation6], %s4317_s17 }
  0x3d   : > { %s482_s25 = sshll.u32 %s475_s27, 4  ;;  %p2901_p5 = scmp.ge.s32.totalorder %s3661_s18, 1  ;;  %s483_s25 = int_to_ptr.vmem [resolvable:$true] %s482_s25 }
  0x3e   : > { %s4323_s22 = scalar_lea.sflag [#allocation7], %s3863_s1  ;;  %p3882_p6 = pneg %p3867_p4 }
  0x3f   : > { %s3314_s24 = scalar_lea.vmem %s483_s25, 512  ;;  %s3663_s4 = smov [#allocation6]  }
  0x40   : > { %p3315_p3 = scmp.ne.s32.totalorder %s483_s25, %s3314_s24  ;;  %s3319_s9 = sshll.u32 %s3663_s4, 4  ;;  %s3320_s9 = int_to_ptr.vmem [resolvable:$false] %s3319_s9 }
  0x41   : > { %s3321_s30 = scalar_lea.vmem %s3320_s9, 1024  ;;  %p3322_p10 = scmp.lt.s32.totalorder %s483_s25, %s3320_s9 }
  0x42   : > { %s481_s28 = scalar_lea.hbm %s4362_s3, %s2955_s20  ;;  %p3317_p7 = pnand %p3315_p3, %p3882_p6 }
  0x43   : > { %p3323_p11 = scmp.lt.s32.totalorder %s3321_s30, %s3314_s24 }
  0x44   : > { %p3318_p9 = pneg %p3317_p7 }
  0x45   : > { %p3324_p13 = por %p3323_p11, %p3322_p10 }
  0x47   : > { %p3325_p0 = pnand %p3324_p13, %p3318_p9 }
  0x49   : > { %3328 = shalt.err (!%p3325_p0)
}
  0x4a   : > { %s3664_s27 = smov 128   ;;  %s3665_s17 = smov 8  }
  0x4b   : > { %3150 = dma.hbm_to_vmem [thread:$0]  (!%p3867_p4), %s481_s28, 512, %s483_s25, %s4323_s22, %s3664_s27, %s3664_s27, %s3665_s17  }
  0x4c   : > { %p616_p1 = scmp.lt.s32.totalorder %s3661_s18, 5  ;;  %s4364_s7 = sld [smem:[#allocation46_spill]] }
  0x4d   : > { %s4366_s3 = sshll.u32 %s3856_s23, 5  ;;  %s3905_s15 = sshll.u32 %s3653_s16, 4 }
  0x4e   : > { %p3898_p3 = pnand %p2901_p5, %p616_p1  ;;  %s525_s0 = scalar_lea.vmem [#allocation9], %s4366_s3 }
  0x4f   : > { %s532_s14 = sshll.u32 %s525_s0, 4  ;;  %s4324_s26 = scalar_lea.sflag [#allocation10], %s3863_s1  ;;  %s533_s14 = int_to_ptr.vmem [resolvable:$true] %s532_s14 }
  0x50   : > { %s3342_s19 = scalar_lea.vmem %s533_s14, 512  ;;  %s3666_s25 = smov [#allocation9]  }
  0x51   : > { %p3343_p7 = scmp.ne.s32.totalorder %s533_s14, %s3342_s19  ;;  %s3347_s28 = sshll.u32 %s3666_s25, 4  ;;  %s3348_s28 = int_to_ptr.vmem [resolvable:$false] %s3347_s28 }
  0x52   : > { %s531_s24 = scalar_lea.hbm %s4364_s7, %s2955_s20  ;;  %s3349_s20 = scalar_lea.vmem %s3348_s28, 1024 }
  0x53   : > { %p3345_p9 = pnand %p3343_p7, %p3882_p6  ;;  %p3350_p5 = scmp.lt.s32.totalorder %s533_s14, %s3348_s28 }
  0x54   : > { %p3351_p11 = scmp.lt.s32.totalorder %s3349_s20, %s3342_s19 }
  0x55   : > { %p3346_p10 = pneg %p3345_p9 }
  0x56   : > { %p3352_p13 = por %p3351_p11, %p3350_p5 }
  0x58   : > { %p3353_p0 = pnand %p3352_p13, %p3346_p10 }
  0x5a   : > { %3356 = shalt.err (!%p3353_p0)
}
  0x5b   : > { %3156 = dma.hbm_to_vmem [thread:$0]  (!%p3867_p4), %s531_s24, 512, %s533_s14, %s4324_s26, %s3664_s27, %s3664_s27, %s3665_s17  }
  0x5c   : > { %s4367_s10 = sld [smem:[#allocation49_spill]]  ;;  %s570_s9 = scalar_lea.vmem [#allocation12], %s3856_s23 }
  0x5d   : > { %s577_s25 = sshll.u32 %s570_s9, 4  ;;  %s4325_s19 = scalar_lea.sflag [#allocation13], %s3863_s1  ;;  %s578_s25 = int_to_ptr.vmem [resolvable:$true] %s577_s25 }
  0x5e   : > { %s3370_s28 = scalar_lea.vmem %s578_s25, 16  ;;  %s3667_s20 = smov [#allocation12]  }
  0x5f   : > { %p3371_p1 = scmp.ne.s32.totalorder %s578_s25, %s3370_s28  ;;  %s3375_s22 = sshll.u32 %s3667_s20, 4  ;;  %s3376_s22 = int_to_ptr.vmem [resolvable:$false] %s3375_s22 }
  0x60   : > { %s3377_s7 = scalar_lea.vmem %s3376_s22, 32  ;;  %p3378_p10 = scmp.lt.s32.totalorder %s578_s25, %s3376_s22 }
  0x61   : > { %p3373_p7 = pnand %p3371_p1, %p3882_p6  ;;  %p3379_p5 = scmp.lt.s32.totalorder %s3377_s7, %s3370_s28 }
  0x62   : > { %s575_s4 = scalar_lea.hbm %s4367_s10, %s3905_s15 }
  0x63   : > { %p3374_p9 = pneg %p3373_p7  ;;  %p3380_p11 = por %p3379_p5, %p3378_p10 }
  0x65   : > { %p3381_p13 = pnand %p3380_p11, %p3374_p9 }
  0x67   : > { %3384 = shalt.err (!%p3381_p13)
}
  0x68   : > { %3162 = dma.hbm_to_vmem [thread:$0]  (!%p3867_p4), %s575_s4, 16, %s578_s25, %s4325_s19  }
  0x69   : > { %s3122_s14 = smul.u32 3, %s3856_s23  ;;  %s4368_s2 = sld [smem:[#allocation41_spill]] }
  0x6a   : > { %s3123_s17 = smul.u32 48, %s3653_s16  ;;  %s4369_s6 = sld [smem:[#allocation45_spill]] }
  0x6b   : > { %s454_s7 = scalar_lea.vmem [#allocation3], %s3122_s14  ;;  %s451_s20 = scalar_lea.sflag [#allocation4], %s3856_s23 }
  0x6c   : > { %s461_s0 = sshll.u32 %s454_s7, 4  ;;  %s3668_s4 = smov [#allocation3]   ;;  %s462_s0 = int_to_ptr.vmem [resolvable:$true] %s461_s0 }
  0x6d   : > { %s3398_s26 = scalar_lea.vmem %s462_s0, 48  ;;  %s3403_s25 = sshll.u32 %s3668_s4, 4  ;;  %s3404_s25 = int_to_ptr.vmem [resolvable:$false] %s3403_s25 }
  0x6e   : > { %p3399_p0 = scmp.ne.s32.totalorder %s462_s0, %s3398_s26  ;;  %s3405_s19 = scalar_lea.vmem %s3404_s25, 96 }
  0x6f   : > { %s460_s22 = scalar_lea.hbm %s4368_s2, %s3123_s17  ;;  %p3406_p9 = scmp.lt.s32.totalorder %s462_s0, %s3404_s25 }
  0x70   : > { %s512_s28 = scalar_lea.hbm %s4369_s6, %s3905_s15  ;;  %p3401_p1 = pnand %p3399_p0, %p3882_p6 }
  0x71   : > { %p3407_p10 = scmp.lt.s32.totalorder %s3405_s19, %s3398_s26 }
  0x72   : > { %p3402_p7 = pneg %p3401_p1 }
  0x73   : > { %p3408_p5 = por %p3407_p10, %p3406_p9 }
  0x75   : > { %p3409_p11 = pnand %p3408_p5, %p3402_p7 }
  0x77   : > { %3412 = shalt.err (!%p3409_p11)
}
  0x78   : > { %s3669_s14 = smov 16   ;;  %s3670_s17 = smov 1  }
  0x79   : > { %3147 = dma.hbm_to_vmem [thread:$0]  (!%p3867_p4), %s460_s22, 48, %s462_s0, %s451_s20, %s3669_s14, %s3669_s14, %s3670_s17  }
  0x7a   : > { %s507_s27 = scalar_lea.vmem [#allocation8], %s3856_s23  ;;  %s4370_s8 = sld [smem:[#allocation47_spill]] }
  0x7b   : > { %s514_s24 = sshll.u32 %s507_s27, 4  ;;  %s3671_s26 = smov [#allocation8]   ;;  %s515_s24 = int_to_ptr.vmem [resolvable:$true] %s514_s24 }
  0x7c   : > { %s3426_s4 = scalar_lea.vmem %s515_s24, 16  ;;  %s3431_s19 = sshll.u32 %s3671_s26, 4  ;;  %s3432_s19 = int_to_ptr.vmem [resolvable:$false] %s3431_s19 }
  0x7d   : > { %p3427_p13 = scmp.ne.s32.totalorder %s515_s24, %s3426_s4  ;;  %s3433_s25 = scalar_lea.vmem %s3432_s19, 32 }
  0x7e   : > { %p3434_p7 = scmp.lt.s32.totalorder %s515_s24, %s3432_s19  ;;  %p3435_p9 = scmp.lt.s32.totalorder %s3433_s25, %s3426_s4 }
  0x7f   : > { %p3429_p0 = pnand %p3427_p13, %p3882_p6 }
  0x80   : > { %s550_s9 = scalar_lea.hbm %s4370_s8, %s3905_s15  ;;  %p3436_p10 = por %p3435_p9, %p3434_p7 }
  0x81   : > { %p3430_p1 = pneg %p3429_p0 }
  0x83   : > { %p3437_p5 = pnand %p3436_p10, %p3430_p1 }
  0x85   : > { %3440 = shalt.err (!%p3437_p5)
}
  0x86   : > { %s4371_s22 = scalar_lea.sflag [#allocation7], %s3863_s1  ;;  %s545_s14 = scalar_lea.vmem [#allocation11], %s3856_s23 }
  0x87   : > { %3153 = dma.hbm_to_vmem [thread:$0]  (!%p3867_p4), %s512_s28, 16, %s515_s24, %s4371_s22  }
  0x88   : > { %s552_s17 = sshll.u32 %s545_s14, 4  ;;  %s4372_s11 = sld [smem:[#allocation50_spill]]  ;;  %s553_s17 = int_to_ptr.vmem [resolvable:$true] %s552_s17 }
  0x89   : > { %s3454_s4 = scalar_lea.vmem %s553_s17, 16  ;;  %s3672_s26 = smov [#allocation11]  }
  0x8a   : > { %p3455_p11 = scmp.ne.s32.totalorder %s553_s17, %s3454_s4  ;;  %s3459_s19 = sshll.u32 %s3672_s26, 4  ;;  %s3460_s19 = int_to_ptr.vmem [resolvable:$false] %s3459_s19 }
  0x8b   : > { %s3461_s25 = scalar_lea.vmem %s3460_s19, 32  ;;  %p3462_p1 = scmp.lt.s32.totalorder %s553_s17, %s3460_s19 }
  0x8c   : > { %p3457_p13 = pnand %p3455_p11, %p3882_p6  ;;  %p3463_p7 = scmp.lt.s32.totalorder %s3461_s25, %s3454_s4 }
  0x8e   : > { %s592_s3 = scalar_lea.hbm %s4372_s11, %s3905_s15  ;;  %p3458_p0 = pneg %p3457_p13 }
  0x8f   : > { %p3464_p9 = por %p3463_p7, %p3462_p1 }
  0x91   : > { %p3465_p10 = pnand %p3464_p9, %p3458_p0 }
  0x93   : > { %3468 = shalt.err (!%p3465_p10)
}
  0x94   : > { %s4373_s28 = scalar_lea.sflag [#allocation10], %s3863_s1  ;;  %s587_s0 = scalar_lea.vmem [#allocation14], %s3856_s23 }
  0x95   : > { %3159 = dma.hbm_to_vmem [thread:$0]  (!%p3867_p4), %s550_s9, 16, %s553_s17, %s4373_s28  }
  0x96   : > { %s594_s20 = sshll.u32 %s587_s0, 4  ;;  %s3673_s27 = smov [#allocation14]   ;;  %s595_s20 = int_to_ptr.vmem [resolvable:$true] %s594_s20 }
  0x97   : > { %s3482_s14 = scalar_lea.vmem %s595_s20, 16  ;;  %s3487_s7 = sshll.u32 %s3673_s27, 4  ;;  %s3488_s7 = int_to_ptr.vmem [resolvable:$false] %s3487_s7 }
  0x98   : > { %p3483_p5 = scmp.ne.s32.totalorder %s595_s20, %s3482_s14  ;;  %s3489_s4 = scalar_lea.vmem %s3488_s7, 32 }
  0x99   : > { %p3490_p0 = scmp.lt.s32.totalorder %s595_s20, %s3488_s7  ;;  %p3491_p1 = scmp.lt.s32.totalorder %s3489_s4, %s3482_s14 }
  0x9a   : > { %p3485_p11 = pnand %p3483_p5, %p3882_p6 }
  0x9b   : > { %p3492_p7 = por %p3491_p1, %p3490_p0 }
  0x9c   : > { %p3486_p13 = pneg %p3485_p11 }
  0x9e   : > { %p3493_p9 = pnand %p3492_p7, %p3486_p13 }
  0xa0   : > { %3496 = shalt.err (!%p3493_p9)
}
  0xa1   : > { %s4374_s9 = scalar_lea.sflag [#allocation13], %s3863_s1  ;;  %s4375_s12 = sld [smem:[#allocation51_spill]] }
  0xa2   : > { %3165 = dma.hbm_to_vmem [thread:$0]  (!%p3867_p4), %s592_s3, 16, %s595_s20, %s4374_s9  }
  0xa3   : > { %s604_s24 = scalar_lea.vmem [#allocation15], %s3856_s23  ;;  %s602_s0 = scalar_lea.sflag [#allocation16], %s3856_s23 }
  0xa4   : > { %s611_s22 = sshll.u32 %s604_s24, 4  ;;  %s3674_s1 = smov [#allocation15]   ;;  %s612_s22 = int_to_ptr.vmem [resolvable:$true] %s611_s22 }
  0xa5   : > { %s3510_s14 = scalar_lea.vmem %s612_s22, 16  ;;  %s3515_s27 = sshll.u32 %s3674_s1, 4  ;;  %s3516_s27 = int_to_ptr.vmem [resolvable:$false] %s3515_s27 }
  0xa6   : > { %p3511_p10 = scmp.ne.s32.totalorder %s612_s22, %s3510_s14  ;;  %s3517_s7 = scalar_lea.vmem %s3516_s27, 32 }
  0xa7   : > { %s609_s28 = scalar_lea.hbm %s4375_s12, %s3905_s15  ;;  %p3518_p13 = scmp.lt.s32.totalorder %s612_s22, %s3516_s27 }
  0xa8   : > { %p3513_p5 = pnand %p3511_p10, %p3882_p6  ;;  %p3519_p0 = scmp.lt.s32.totalorder %s3517_s7, %s3510_s14 }
  0xaa   : > { %p3514_p11 = pneg %p3513_p5  ;;  %p3520_p1 = por %p3519_p0, %p3518_p13 }
  0xac   : > { %p3521_p7 = pnand %p3520_p1, %p3514_p11 }
  0xae   : > { %3524 = shalt.err (!%p3521_p7)
}
  0xaf   : > { %3168 = dma.hbm_to_vmem [thread:$0]  (!%p3867_p4), %s609_s28, 16, %s612_s22, %s602_s0  }
  0xb0   : > { %620 = sbr.rel (%p3898_p3) target bundleno = 2927 (0xb6f), region = 72  ;;  %s3997_s15 = sand.u32 (!%p3898_p3), 1, %s3637_s29  }
  0xb1   : > { %s3124_s23 = smul.u32 (!%p3898_p3), 3, %s3997_s15  ;;  %s623_s13 = scalar_lea.sflag (!%p3898_p3), [#allocation4], %s3997_s15 }
  0xb3   : > { %s4001_s3 = scalar_lea.vmem (!%p3898_p3), [#allocation3], %s3124_s23 }
  0xb5   : > { %3596 = dma.done.wait (%p3835_p8), %s623_s13, 48  }
  0xb6   : > { %3598 = vsyncadd (%p3835_p8), %s623_s13, 4294967248  ;;  %s4376_s5 = sld [smem:[#allocation32_spill]]  ;;  %s2902_s20 = sshll.u32 %s3997_s15, 5 }
  0xb7   : > { %s4009_s9 = scalar_lea.vmem [#allocation6], %s2902_s20 }
  0xbc   : > { %s631_s30 = sand.u32 1, %s4376_s5  }
  0xbd   : > { %s632_s4 = scalar_lea.sflag [#allocation7], %s631_s30 }
  0xbe   : > { %3600 = dma.done.wait (%p3835_p8), %s632_s4, 528  }
  0xbf   : > { %3602 = vsyncadd (%p3835_p8), %s632_s4, 4294966768  ;;  %s649_s26 = scalar_lea.sflag [#allocation10], %s631_s30  ;;  %s4016_s19 = scalar_lea.vmem [#allocation9], %s2902_s20 }
  0xc0   : > { %3604 = dma.done.wait (%p3835_p8), %s649_s26, 528  }
  0xc1   : > { %3606 = vsyncadd (%p3835_p8), %s649_s26, 4294966768  ;;  %s666_s28 = scalar_lea.sflag [#allocation13], %s631_s30 }
  0xc2   : > { %3608 = dma.done.wait (%p3835_p8), %s666_s28, 32  }
  0xc3   : > { %3610 = vsyncadd (%p3835_p8), %s666_s28, 4294967264  ;;  %s682_s0 = scalar_lea.sflag [#allocation16], %s3997_s15 }
  0xc4   : > { %3612 = dma.done.wait (%p3835_p8), %s682_s0, 16  }
  0xc5   : > { %3614 = vsyncadd (%p3835_p8), %s682_s0, 4294967280  ;;  %s4377_s1 = sld [smem:[#allocation25_spill]] }
  0xc6   : > { %s4378_s27 = sld [smem:[#allocation29_spill]] }
  0xc7   : > { %s4379_s7 = sld [smem:[#allocation28_spill]] }
  0xc8   : > { %s4380_s4 = sld [smem:[#allocation39_spill]] }
  0xc9   : > { %s4382_s25 = sld [smem:[#allocation44_spill]] }
  0xca   : > { %s4383_s8 = sld [smem:[#allocation40_spill]] }
  0xcb   : > { %s4326_s23 = sand.u32 1, %s4377_s1   ;;  %s4381_s1 = sld [smem:[#allocation43_spill]] }
  0xcc   : > { %p777_p4 = scmp.lt.s32.totalorder %s4378_s27, 1  ;;  %s4039_s13 = sshll.u32 %s4326_s23, 3 }
  0xcd   : > { %p781_p6 = scmp.lt.s32.totalorder %s4379_s7, 1  ;;  %s4384_s16 = sld [smem:[#allocation48_spill]] }
  0xce   : > { %s4419_s27 = smov (!%p777_p4, %s4378_s27), 1  ;;  %p2909_p8 = scmp.ne.s32.totalorder %s4379_s7, 0 }
  0xcf   : > { %s4044_s5 = scalar_select %p781_p6, %s4379_s7, 1 }
  0xd0   : > { %s2905_s21 = sshll.u32 %s4419_s27, 3  ;;  %800 = sbr.rel (%p2909_p8) target bundleno = 215 (0xd7), region = 108 }
  0xd1   : > { %s780_s26 = scalar_lea.vmem %s4380_s4, %s2905_s21  ;;  %s3125_s28 = smul.u32 96, %s4044_s5 }
  0xd2   : > { %s788_s23 = scalar_lea.vmem %s4381_s1, %s4044_s5  ;;  %s791_s17 = scalar_lea.vmem %s4382_s25, %s4044_s5 }
  0xd3   : > { %s4061_s10 = scalar_lea.vmem %s4383_s8, %s3125_s28  ;;  %s2957_s11 = sshll.u32 %s4044_s5, 6 }
  0xd4   : > { %s4067_s30 = scalar_lea.vmem %s4384_s16, %s2957_s11  ;;  %s776_s21 = scalar_lea.vmem [#allocation17], %s4039_s13 }
  0xd5   : > { %v801_v0 = vld [vmem:[%s780_s26] sm:$0xff]  ;;  %vm802_vm0 = vcmask 261120  }
  0xd6   : > { %803 = vst.msk [vmem:[#allocation2] sm:$0xff] %vm802_vm0, %v801_v0 }
  0xd7 PF: > { %v808_v1 = vld [vmem:[%s4061_s10 + $0x18] sm:$0xff]  ;;  %v3675_v2 = vmov 0.0   ;;  %v807_v3 = vld [vmem:[%s4061_s10 + $0x10] sm:$0xff]  ;;  %vm3676_vm1 = vmmov 0   ;;  %v806_v4 = vld [vmem:[%s4061_s10 + $0x8] sm:$0xff]  ;;  %vm816_vm2 = vcmask 261120  }
  0xd8   : > { %3008 = vmatprep.subr.mxu1 %v3675_v2  ;;  %3016 = vmatprep.mubr.msk.f32.mxu1 %vm3676_vm1, %v3675_v2  ;;  %v805_v5 = vld [vmem:[%s4061_s10] sm:$0xff]  ;;  %v2915_v7 = vld [vmem:[%s4061_s10 + $0x38] sm:$0xff]  ;;  %v2914_v8 = vld [vmem:[%s4061_s10 + $0x30] sm:$0xff]  ;;  %s3677_s2 = smov 104   ;;  %s3678_s6 = smov 120   ;;  %vm1211_vm3 = vcmask 64512  }
  0xd9   : > { %3009 = vmatpush3.msra.mxu1 %v808_v1  ;;  %3030 = vmatprep.subr.mxu0 %v3675_v2  ;;  %v2913_v9 = vld [vmem:[%s4061_s10 + $0x28] sm:$0xff]  ;;  %v2912_v10 = vld [vmem:[%s4061_s10 + $0x20] sm:$0xff]  ;;  %s3679_s8 = smov 112   ;;  %v2922_v19 = vld [vmem:[%s4061_s10 + $0x58] sm:$0xff]  ;;  %s3683_s11 = smov 8   ;;  %vm2257_vm4 = vcmask 130048  }
  0xda   : > { %3010 = vmatprep.subr.mxu1 %v3675_v2  ;;  %3038 = vmatprep.mubr.msk.f32.mxu0 %vm3676_vm1, %v3675_v2  ;;  %v2917_v13 = vld [vmem:[%s4001_s3 + $0x1] ss:$0 sm:$0xff]  ;;  %v2910_v16 = vld [vmem:[%s4001_s3] ss:$0 sm:$0xff]  ;;  %v2921_v20 = vld [vmem:[%s4061_s10 + $0x50] sm:$0xff]  ;;  %s3684_s12 = smov 24  }
  0xdb   : > { %3011 = vmatpush3.msra.mxu1 %v807_v3  ;;  %3031 = vmatpush3.msra.mxu0 %v2922_v19  ;;  %v2920_v21 = vld [vmem:[%s4061_s10 + $0x48] sm:$0xff]  ;;  %v2919_v22 = vld [vmem:[%s4061_s10 + $0x40] sm:$0xff]  ;;  %s3682_s10 = smov 16   ;;  %vm2259_vm5 = vcmask 195584   ;;  %s4387_s22 = scalar_lea.vmem [#allocation8], %s3997_s15  ;;  %vm2482_vm8 = vcmask 523264  }
  0xdc   : > { %3012 = vmatprep.subr.mxu1 %v3675_v2  ;;  %3032 = vmatprep.subr.mxu0 %v3675_v2  ;;  %v2924_v51 = vld [vmem:[%s4001_s3 + $0x2] ss:$0 sm:$0xff]  ;;  %s4389_s14 = scalar_lea.vmem [#allocation12], %s3997_s15  ;;  %s4390_s7 = scalar_lea.vmem [#allocation14], %s3997_s15 }
  0xdd   : > { %3013 = vmatpush3.msra.mxu1 %v806_v4  ;;  %v4083_v6 = vld [vmem:[#allocation2] sm:$0xff]  ;;  %3033 = vmatpush3.msra.mxu0 %v2921_v20  ;;  %s4392_s5 = sld [smem:[#allocation28_spill]] }
  0xde   : > { %3014 = vmatprep.subr.mxu1 %v3675_v2  ;;  %3034 = vmatprep.subr.mxu0 %v3675_v2 }
  0xdf   : > { %3015 = vmatpush3.msra.mxu1 %v805_v5  ;;  %3035 = vmatpush3.msra.mxu0 %v2920_v21 }
  0xe0   : > { %3017 = vmatmul.mubr.msk.f32.vlgmr.msra.gmra.mxu1 %vm816_vm2, %v4083_v6  ;;  %3019 = vmatprep.subr.mxu1 %v3675_v2 }
  0xe1   : > { %3020 = vmatpush3.msra.mxu1 %v2915_v7  ;;  %3027 = vmatprep.mubr.msk.f32.mxu1 %vm3676_vm1, %v3675_v2 }
  0xe2   : > { %3021 = vmatprep.subr.mxu1 %v3675_v2  ;;  %3036 = vmatprep.subr.mxu0 %v3675_v2 }
  0xe3   : > { %3022 = vmatpush3.msra.mxu1 %v2914_v8  ;;  %3037 = vmatpush3.msra.mxu0 %v2919_v22  ;;  %p2950_p3 = scmp.ne.s32.totalorder %s4392_s5, 1 }
  0xe4   : > { %3023 = vmatprep.subr.mxu1 %v3675_v2  ;;  %3039 = vmatmul.mubr.msk.f32.vlgmr.msra.gmra.mxu0 %vm816_vm2, %v4083_v6 }
  0xe5   : > { %3024 = vmatpush3.msra.mxu1 %v2913_v9  ;;  %3051 = vmatprep.subr.mxu0 %v3675_v2 }
  0xe6   : > { %3025 = vmatprep.subr.mxu1 %v3675_v2  ;;  %3053 = vmatprep.mubr.msk.f32.mxu0 %vm3676_vm1, %v3675_v2 }
  0xe7   : > { %3026 = vmatpush3.msra.mxu1 %v2912_v10 }
  0xe8   : > { %3028 = vmatmul.mubr.msk.f32.vlgmr.msra.gmra.mxu1 %vm816_vm2, %v4083_v6  ;;  %3041 = vmatprep.subr.mxu1 %v3675_v2 }
  0xe9   : > { %3043 = vmatprep.mubr.msk.f32.mxu1 %vm3676_vm1, %v3675_v2 }
 0x1a0   : > { %v886_v11 = vpop.f32.mrf.mxu1 }
 0x1a1   : > { %v887_v18 = vadd.f32 %v2910_v16, %v886_v11 }
 0x1a2   : > { %v3018_v12 = vpop.f32.mrf.mxu1 }
 0x1a4   : > { %v1052_v33 = vpop.f32.mrf.mxu0 }
 0x1a5   : > { %v1053_v52 = vadd.f32 %v2924_v51, %v1052_v33 }
 0x1a6   : > { %v3040_v34 = vpop.f32.mrf.mxu0 }
 0x1a8   : > { %v969_v14 = vpop.f32.mrf.mxu1 }
 0x1a9   : > { %v970_v15 = vadd.f32 %v2917_v13, %v969_v14 }
 0x1aa   : > { %v3029_v17 = vpop.f32.mrf.mxu1 }
 0x1ab   : > { %1070 = vrot.lane.b32.xlu1 %v970_v15, %s3677_s2  ;;  %1064 = vrot.lane.b32.xlu0 %v970_v15, %s3678_s6 }
 0x1af   : > { %1057 = vrot.lane.b32.xlu1 %v887_v18, %s3678_s6  ;;  %1067 = vrot.lane.b32.xlu0 %v970_v15, %s3679_s8 }
 0x1b3   : > { %1061 = vrot.lane.b32.xlu1 %v887_v18, %s3677_s2  ;;  %1059 = vrot.lane.b32.xlu0 %v887_v18, %s3679_s8 }
 0x1d1   : > { %1083 = vxpose.xlu0.b32.start.end [1/1] (short) (narrow) %v970_v15, 8 }
 0x21d   : > { %v1065_v23 = vpop.permute.xlu0 %1064  ;;  %v1071_v25 = vpop.permute.xlu1 %1070 }
 0x21e   : > { %1115 = vxpose.xlu1.b32.start.end [1/1] (short) (narrow) %v1065_v23, 8 }
 0x221   : > { %v1068_v24 = vpop.permute.xlu0 %1067  ;;  %v1058_v28 = vpop.permute.xlu1 %1057 }
 0x222   : > { %1147 = vxpose.xlu0.b32.start.end [1/1] (short) (narrow) %v1068_v24, 8 }
 0x225   : > { %v1060_v26 = vpop.permute.xlu0 %1059  ;;  %v1062_v29 = vpop.permute.xlu1 %1061 }
 0x226   : > { %1179 = vxpose.xlu0.b32.start.end [1/1] (short) (narrow) %v1071_v25, 8 }
 0x24d   : > { %v1099_v27 = vpop.trf.xlu0 }
 0x24e   : > { %3042 = vmatpush3.msra.mxu1 %v1099_v27 }
 0x24f   : > { %3044 = vmatmul.mubr.msk.f32.vlgmr.msra.gmra.mxu1 %vm1211_vm3, %v887_v18  ;;  %3046 = vmatprep.subr.mxu1 %v3675_v2 }
 0x250   : > { %3048 = vmatprep.mubr.msk.f32.mxu1 %vm3676_vm1, %v3675_v2 }
 0x29a   : > { %v1131_v30 = vpop.trf.xlu1 }
 0x29b   : > { %3047 = vmatpush3.msra.mxu1 %v1131_v30 }
 0x29c   : > { %3049 = vmatmul.mubr.msk.f32.vlgmr.msra.gmra.mxu1 %vm1211_vm3, %v1058_v28  ;;  %3056 = vmatprep.subr.mxu1 %v3675_v2 }
 0x29d   : > { %3058 = vmatprep.mubr.msk.f32.mxu1 %vm3676_vm1, %v3675_v2 }
 0x29e   : > { %v1163_v31 = vpop.trf.xlu0 }
 0x29f   : > { %3052 = vmatpush3.msra.mxu0 %v1163_v31 }
 0x2a0   : > { %3054 = vmatmul.mubr.msk.f32.vlgmr.msra.gmra.mxu0 %vm1211_vm3, %v1060_v26  ;;  %3061 = vmatprep.subr.mxu0 %v3675_v2 }
 0x2a1   : > { %3063 = vmatprep.mubr.msk.f32.mxu0 %vm3676_vm1, %v3675_v2 }
 0x2a2   : > { %v1195_v32 = vpop.trf.xlu0 }
 0x2a3   : > { %3057 = vmatpush3.msra.mxu1 %v1195_v32 }
 0x2a4   : > { %3059 = vmatmul.mubr.msk.f32.vlgmr.msra.gmra.mxu1 %vm1211_vm3, %v1062_v29  ;;  %3066 = vmatprep.subr.mxu1 %v3675_v2 }
 0x2a5   : > { %3068 = vmatprep.mubr.msk.f32.mxu1 %vm3676_vm1, %v3675_v2 }
 0x30f   : > { %v1280_v35 = vpop.f32.mrf.mxu1 }
 0x310   : > { %v1500_v36 = vmul.f32 0.35355338, %v1280_v35 }
 0x311   : > { %v3045_v37 = vpop.f32.mrf.mxu1 }
 0x312   : > { %v1504_v38 = vsel %vm1211_vm3, %v1500_v36, -inf }
 0x313   : > { %1505 = vmax.xlane.f32.xlu0 %v1504_v38  ;;  %v2264_v38 = vld [vmem:[%s4009_s9 + $0x18] sm:$0xff] }
 0x35c   : > { %v1352_v39 = vpop.f32.mrf.mxu1 }
 0x35d   : > { %v1501_v40 = vmul.f32 0.35355338, %v1352_v39  ;;  %v3680_v39 = vmov 1983009808  }
 0x35e   : > { %v3050_v41 = vpop.f32.mrf.mxu1 }
 0x35f   : > { %v1507_v42 = vsel %vm1211_vm3, %v1501_v40, -inf  ;;  %v2113_v41 = vlaneseq }
 0x360   : > { %v1424_v43 = vpop.f32.mrf.mxu0  ;;  %1508 = vmax.xlane.f32.xlu1 %v1507_v42 }
 0x361   : > { %v1502_v44 = vmul.f32 0.35355338, %v1424_v43  ;;  %v3681_v43 = vmov 1934713408  }
 0x362   : > { %v3055_v45 = vpop.f32.mrf.mxu0 }
 0x363   : > { %v1510_v46 = vsel %vm1211_vm3, %v1502_v44, -inf }
 0x364   : > { %1511 = vmax.xlane.f32.xlu1 %v1510_v46  ;;  %v1496_v47 = vpop.f32.mrf.mxu1  ;;  %v2114_v46 = vshrl.u32 %v2113_v41, 7 }
 0x365   : > { %v1503_v48 = vmul.f32 0.35355338, %v1496_v47 }
 0x366   : > { %v3060_v49 = vpop.f32.mrf.mxu1 }
 0x367   : > { %v1513_v50 = vsel %vm1211_vm3, %v1503_v48, -inf }
 0x368   : > { %1514 = vmax.xlane.f32.xlu0 %v1513_v50 }
 0x375   : > { %1074 = vrot.lane.b32.xlu1 %v1053_v52, %s3678_s6 }
 0x379   : > { %1080 = vrot.lane.b32.xlu1 %v1053_v52, %s3677_s2 }
 0x37e   : > { %1077 = vrot.lane.b32.xlu0 %v1053_v52, %s3679_s8 }
 0x39c   : > { %v1506_v53 = vpop.xlane.xlu0 %1505 }
 0x39d   : > { %v1516_v54 = vsub.f32 %v1500_v36, %v1506_v53 }
 0x39f   : > { %v1520_v55 = vmul.f32 1.442695, %v1516_v54 }
 0x3a1   : > { %3277 = vpow2.f32 %v1520_v55 }
 0x3ae   : > { %v3278_v56 = vpop.eup %3277 }
 0x3af   : > { %v1528_v57 = vsel %vm1211_vm3, %v3278_v56, 0.0 }
 0x3b0   : > { %1529 = vadd.xlane.f32.xlu0 %v1528_v57 }
 0x3e9   : > { %v1509_v58 = vpop.xlane.xlu1 %1508 }
 0x3ea   : > { %v1517_v59 = vsub.f32 %v1501_v40, %v1509_v58  ;;  %v2111_v40 = vunpack.c.l.s4 %v3680_v39 }
 0x3ec   : > { %v1522_v60 = vmul.f32 1.442695, %v1517_v59  ;;  %v2112_v45 = vunpack.c.0.s8 %v2111_v40 }
 0x3ed   : > { %v1512_v61 = vpop.xlane.xlu1 %1511 }
 0x3ee   : > { %3279 = vpow2.f32 %v1522_v60  ;;  %v1518_v62 = vsub.f32 %v1502_v44, %v1512_v61  ;;  %v2143_v44 = vunpack.c.l.s4 %v3681_v43  ;;  %v2115_v50 = vsub.s32 %v2112_v45, %v2114_v46 }
 0x3f0   : > { %v1524_v63 = vmul.f32 1.442695, %v1518_v62  ;;  %v2144_v49 = vunpack.c.0.s8 %v2143_v44 }
 0x3f1   : > { %v1515_v0 = vpop.xlane.xlu0 %1514  ;;  %v1075_v11 = vpop.permute.xlu1 %1074 }
 0x3f2   : > { %3281 = vpow2.f32 %v1524_v63  ;;  %v1519_v1 = vsub.f32 %v1503_v48, %v1515_v0 }
 0x3f4   : > { %v1526_v3 = vmul.f32 1.442695, %v1519_v1  ;;  %v2263_v1 = vld [vmem:[%s4009_s9 + $0x10] sm:$0xff] }
 0x3f5   : > { %v1081_v12 = vpop.permute.xlu1 %1080  ;;  %v1078_v13 = vpop.permute.xlu0 %1077 }
 0x3f6   : > { %3283 = vpow2.f32 %v1526_v3  ;;  %v2262_v3 = vld [vmem:[%s4009_s9 + $0x8] sm:$0xff] }
 0x3fb   : > { %v3280_v4 = vpop.eup %3279 }
 0x3fc   : > { %v1531_v5 = vsel %vm1211_vm3, %v3280_v4, 0.0 }
 0x3fd   : > { %1532 = vadd.xlane.f32.xlu0 %v1531_v5 }
 0x3ff   : > { %v3282_v7 = vpop.eup %3281 }
 0x400   : > { %v1534_v8 = vsel %vm1211_vm3, %v3282_v7, 0.0 }
 0x401   : > { %1535 = vadd.xlane.f32.xlu1 %v1534_v8 }
 0x403   : > { %v3284_v9 = vpop.eup %3283 }
 0x404   : > { %v1537_v10 = vsel %vm1211_vm3, %v3284_v9, 0.0 }
 0x405   : > { %1538 = vadd.xlane.f32.xlu0 %v1537_v10 }
 0x432   : > { %1580 = vxpose.xlu0.b32.start.end [1/1] (short) (narrow) %v1075_v11, 8 }
 0x434   : > { %1548 = vxpose.xlu1.b32.start.end [1/1] (short) (narrow) %v1053_v52, 8 }
 0x436   : > { %1644 = vxpose.xlu0.b32.start.end [1/1] (short) (narrow) %v1081_v12, 8 }
 0x438   : > { %1612 = vxpose.xlu1.b32.start.end [1/1] (short) (narrow) %v1078_v13, 8  ;;  %v2261_v13 = vld [vmem:[%s4009_s9] sm:$0xff] }
 0x439   : > { %v1530_v14 = vpop.xlane.xlu0 %1529 }
 0x43a   : > { %3285 = vrcp.f32 %v1530_v14 }
 0x447   : > { %v3286_v15 = vpop.eup %3285 }
 0x448   : > { %v1544_v16 = vmul.f32 %v3286_v15, %v3278_v56  ;;  %v2147_v56 = vsub.s32 %v2144_v49, %v2114_v46  ;;  %v2382_v49 = vld [vmem:[%s4016_s19] sm:$0xff] }
 0x44a   : > { %3062 = vmatpush3.xpose.msk.msra.mxu0 %vm1211_vm3, %v1544_v16 }
 0x44b   : > { %3071 = vmatprep.subr.mxu0 %v3675_v2 }
 0x486   : > { %v1533_v17 = vpop.xlane.xlu0 %1532 }
 0x487   : > { %3287 = vrcp.f32 %v1533_v17 }
 0x48a   : > { %v1536_v21 = vpop.xlane.xlu1 %1535 }
 0x48e   : > { %v1539_v20 = vpop.xlane.xlu0 %1538 }
 0x48f   : > { %3289 = vrcp.f32 %v1539_v20 }
 0x490   : > { %3291 = vrcp.f32 %v1536_v21 }
 0x494   : > { %v3288_v18 = vpop.eup %3287 }
 0x495   : > { %v1545_v19 = vmul.f32 %v3288_v18, %v3280_v4 }
 0x497   : > { %3067 = vmatpush3.xpose.msk.msra.mxu1 %vm1211_vm3, %v1545_v19 }
 0x498   : > { %3076 = vmatprep.subr.mxu1 %v3675_v2 }
 0x49c   : > { %v3290_v22 = vpop.eup %3289 }
 0x49d   : > { %v3292_v23 = vpop.eup %3291  ;;  %v1547_v25 = vmul.f32 %v3290_v22, %v3284_v9 }
 0x49e   : > { %v1546_v27 = vmul.f32 %v3292_v23, %v3282_v7 }
 0x4ae   : > { %v1596_v24 = vpop.trf.xlu0 }
 0x4af   : > { %3069 = vmatmul.mubr.msk.f32.vlgmr.msra.gmra.mxu1 %vm1211_vm3, %v1596_v24 }
 0x4b0   : > { %3077 = vmatpush3.xpose.msk.msra.mxu1 %vm1211_vm3, %v1547_v25  ;;  %v1564_v26 = vpop.trf.xlu1  ;;  %3078 = vmatprep.mubr.msk.f32.mxu1 %vm3676_vm1, %v3675_v2 }
 0x4b1   : > { %3064 = vmatmul.mubr.msk.f32.vlgmr.msra.gmra.mxu0 %vm1211_vm3, %v1564_v26  ;;  %3092 = vmatprep.subr.mxu1 %v3675_v2 }
 0x4b2   : > { %3072 = vmatpush3.xpose.msk.msra.mxu0 %vm1211_vm3, %v1546_v27  ;;  %v1660_v28 = vpop.trf.xlu0  ;;  %3073 = vmatprep.mubr.msk.f32.mxu0 %vm3676_vm1, %v3675_v2 }
 0x4b3   : > { %3079 = vmatmul.mubr.msk.f32.vlgmr.msra.gmra.mxu1 %vm1211_vm3, %v1660_v28  ;;  %3081 = vmatprep.subr.mxu0 %v3675_v2 }
 0x4b4   : > { %v1628_v29 = vpop.trf.xlu1  ;;  %3100 = vmatprep.mubr.msk.f32.mxu1 %vm3676_vm1, %v3675_v2 }
 0x4b5   : > { %3074 = vmatmul.mubr.msk.f32.vlgmr.msra.gmra.mxu0 %vm1211_vm3, %v1628_v29 }
 0x4b6   : > { %3089 = vmatprep.mubr.msk.f32.mxu0 %vm3676_vm1, %v3675_v2  ;;  %3082 = vmatpush3.msra.mxu0 %v2264_v38 }
 0x4b7   : > { %3083 = vmatprep.subr.mxu0 %v3675_v2 }
 0x4b8   : > { %3084 = vmatpush3.msra.mxu0 %v2263_v1 }
 0x4b9   : > { %3085 = vmatprep.subr.mxu0 %v3675_v2 }
 0x4ba   : > { %3086 = vmatpush3.msra.mxu0 %v2262_v3  ;;  %v2943_v3 = vld [vmem:[%s4387_s22] ss:$0 sm:$0xff] }
 0x4bb   : > { %3087 = vmatprep.subr.mxu0 %v3675_v2 }
 0x4bc   : > { %3088 = vmatpush3.msra.mxu0 %v2261_v13 }
 0x4bd   : > { %3103 = vmatprep.subr.mxu0 %v3675_v2 }
 0x56f   : > { %v1824_v30 = vpop.f32.mrf.mxu1 }
 0x570   : > { %2012 = vxpose.xlu0.b32.start.end [1/1] (short) (narrow) %v1824_v30, 8 }
 0x571   : > { %v1748_v31 = vpop.f32.mrf.mxu0  ;;  %v3070_v32 = vpop.f32.mrf.mxu1 }
 0x572   : > { %1980 = vxpose.xlu1.b32.start.end [1/1] (short) (narrow) %v1748_v31, 8 }
 0x573   : > { %v3065_v33 = vpop.f32.mrf.mxu0  ;;  %v1976_v34 = vpop.f32.mrf.mxu1 }
 0x574   : > { %2076 = vxpose.xlu0.b32.start.end [1/1] (short) (narrow) %v1976_v34, 8 }
 0x575   : > { %v1900_v35 = vpop.f32.mrf.mxu0  ;;  %v3080_v36 = vpop.f32.mrf.mxu1 }
 0x576   : > { %2044 = vxpose.xlu1.b32.start.end [1/1] (short) (narrow) %v1900_v35, 8  ;;  %v2940_v36 = vld [vmem:[%s788_s23] ss:$0 sm:$0xff]  ;;  %s4391_s23 = scalar_lea.vmem [#allocation15], %s3997_s15 }
 0x577   : > { %v3075_v37 = vpop.f32.mrf.mxu0 }
 0x5ec   : > { %v2028_v42 = vpop.trf.xlu0 }
 0x5ee   : > { %v1996_v47 = vpop.trf.xlu1 }
 0x5f0   : > { %v2092_v48 = vpop.trf.xlu0 }
 0x5f1   : > { %v2124_v51 = vcombine.low %v2028_v42, %v2092_v48  ;;  %v2125_v52 = vcombine.high %v2028_v42, %v2092_v48  ;;  %v2384_v48 = vld [vmem:[%s4016_s19 + $0x10] sm:$0xff] }
 0x5f2   : > { %v2060_v53 = vpop.trf.xlu1 }
 0x5f3   : > { %v2108_v54 = vcombine.low %v1996_v47, %v2060_v53  ;;  %v2109_v55 = vcombine.high %v1996_v47, %v2060_v53  ;;  %v2132_v57 = vrot.slane %v2124_v51, %v2115_v50  ;;  %v2139_v58 = vrot.slane %v2125_v52, %v2115_v50  ;;  %v2385_v47 = vld [vmem:[%s4016_s19 + $0x18] sm:$0xff]  ;;  %v2473_v51 = vld [vmem:[%s4067_s30 + $0x30] sm:$0xff]  ;;  %v2471_v53 = vld [vmem:[%s4067_s30 + $0x20] sm:$0xff] }
 0x5f4   : > { %3093 = vmatpush3.msra.mxu1 %v2385_v47  ;;  %v2472_v52 = vld [vmem:[%s4067_s30 + $0x28] sm:$0xff] }
 0x5f5   : > { %v2116_v59 = vrot.slane %v2108_v54, %v2115_v50  ;;  %v2123_v60 = vrot.slane %v2109_v55, %v2115_v50  ;;  %3094 = vmatprep.subr.mxu1 %v3675_v2  ;;  %v2470_v54 = vld [vmem:[%s4067_s30 + $0x18] sm:$0xff] }
 0x5f6   : > { %3095 = vmatpush3.msra.mxu1 %v2384_v48 }
 0x5f7   : > { %v2140_v61 = vcombine.low %v2116_v59, %v2132_v57  ;;  %v2141_v62 = vcombine.high %v2116_v59, %v2132_v57  ;;  %v2156_v63 = vcombine.low %v2123_v60, %v2139_v58  ;;  %v2157_v0 = vcombine.high %v2123_v60, %v2139_v58  ;;  %3096 = vmatprep.subr.mxu1 %v3675_v2 }
 0x5f9   : > { %v2148_v4 = vrot.slane %v2140_v61, %v2147_v56  ;;  %v2155_v5 = vrot.slane %v2141_v62, %v2147_v56  ;;  %v2164_v7 = vrot.slane %v2156_v63, %v2147_v56  ;;  %v2171_v8 = vrot.slane %v2157_v0, %v2147_v56  ;;  %v2942_v63 = vld [vmem:[%s791_s17] ss:$0 sm:$0xff]  ;;  %s4388_s17 = scalar_lea.vmem [#allocation11], %s3997_s15 }
 0x5fb   : > { %v2176_v9 = vcombine.low %v2148_v4, %v2155_v5  ;;  %v2938_v10 = vcombine.high %v2148_v4, %v2155_v5  ;;  %v2192_v11 = vcombine.low %v2164_v7, %v2171_v8  ;;  %v2939_v12 = vcombine.high %v2164_v7, %v2171_v8  ;;  %v2469_v7 = vld [vmem:[%s4067_s30 + $0x10] sm:$0xff]  ;;  %v2468_v8 = vld [vmem:[%s4067_s30 + $0x8] sm:$0xff] }
 0x5fd   : > { %v2183_v14 = vrot.slane %v2176_v9, %v2115_v50  ;;  %v2191_v15 = vrot.slane %v2938_v10, %v2115_v50  ;;  %v2199_v16 = vrot.slane %v2192_v11, %v2115_v50  ;;  %v2207_v17 = vrot.slane %v2939_v12, %v2115_v50  ;;  %v2474_v50 = vld [vmem:[%s4067_s30 + $0x38] sm:$0xff]  ;;  %v2467_v9 = vld [vmem:[%s4067_s30] sm:$0xff] }
 0x5fe   : > { %v2944_v10 = vld [vmem:[%s4388_s17] ss:$0 sm:$0xff] }
 0x5ff   : > { %v2209_v18 = vcombine.high %v2183_v14, %v2191_v15  ;;  %v2225_v19 = vcombine.high %v2199_v16, %v2207_v17  ;;  %v2208_v20 = vcombine.low %v2183_v14, %v2191_v15  ;;  %v2224_v21 = vcombine.low %v2199_v16, %v2207_v17  ;;  %v2946_v15 = vld [vmem:[%s4389_s14] ss:$0 sm:$0xff] }
 0x601   : > { %v2223_v22 = vrot.slane %v2209_v18, %v2147_v56  ;;  %v2239_v23 = vrot.slane %v2225_v19, %v2147_v56  ;;  %v2216_v24 = vrot.slane %v2208_v20, %v2147_v56  ;;  %v2232_v25 = vrot.slane %v2224_v21, %v2147_v56 }
 0x603   : > { %v2242_v26 = vcombine.low %v2223_v22, %v2239_v23  ;;  %v2241_v27 = vcombine.high %v2216_v24, %v2232_v25  ;;  %v2240_v28 = vcombine.low %v2216_v24, %v2232_v25  ;;  %v2243_v29 = vcombine.high %v2223_v22, %v2239_v23 }
 0x605   : > { %2249 = vrot.lane.b32.xlu0 %v2242_v26, %s3682_s10  ;;  %2245 = vrot.lane.b32.xlu1 %v2241_v27, %s3683_s11 }
 0x609   : > { %2253 = vrot.lane.b32.xlu1 %v2243_v29, %s3684_s12 }
 0x677   : > { %v2246_v30 = vpop.permute.xlu1 %2245  ;;  %v2250_v31 = vpop.permute.xlu0 %2249 }
 0x678   : > { %v2256_v32 = vsel %vm1211_vm3, %v2240_v28, %v2246_v30 }
 0x679   : > { %v2258_v34 = vsel %vm2257_vm4, %v2256_v32, %v2250_v31 }
 0x67b   : > { %v2254_v33 = vpop.permute.xlu1 %2253 }
 0x67c   : > { %v2260_v35 = vsel %vm2259_vm5, %v2258_v34, %v2254_v33  ;;  %v2948_v33 = vld [vmem:[%s4390_s7] ss:$0 sm:$0xff] }
 0x67d   : > { %3090 = vmatmul.mubr.msk.f32.vlgmr.msra.gmra.mxu0 %vm816_vm2, %v2260_v35 }
 0x67e   : > { %3119 = vmatprep.mubr.msk.f32.mxu0 %vm3676_vm1, %v3675_v2  ;;  %3104 = vmatpush3.msra.mxu0 %v2474_v50 }
 0x67f   : > { %3105 = vmatprep.subr.mxu0 %v3675_v2 }
 0x680   : > { %3106 = vmatpush3.msra.mxu0 %v2473_v51 }
 0x681   : > { %3107 = vmatprep.subr.mxu0 %v3675_v2 }
 0x682   : > { %3108 = vmatpush3.msra.mxu0 %v2472_v52 }
 0x683   : > { %3109 = vmatprep.subr.mxu0 %v3675_v2 }
 0x684   : > { %3110 = vmatpush3.msra.mxu0 %v2471_v53 }
 0x685   : > { %3111 = vmatprep.subr.mxu0 %v3675_v2 }
 0x686   : > { %3112 = vmatpush3.msra.mxu0 %v2470_v54 }
 0x687   : > { %3113 = vmatprep.subr.mxu0 %v3675_v2 }
 0x688   : > { %3114 = vmatpush3.msra.mxu0 %v2469_v7 }
 0x689   : > { %3115 = vmatprep.subr.mxu0 %v3675_v2 }
 0x68a   : > { %3116 = vmatpush3.msra.mxu0 %v2468_v8 }
 0x68b   : > { %3117 = vmatprep.subr.mxu0 %v3675_v2 }
 0x68c   : > { %3118 = vmatpush3.msra.mxu0 %v2467_v9 }
 0x73d   : > { %v2341_v37 = vpop.f32.mrf.mxu0 }
 0x73e   : > { %v2342_v38 = vadd.f32 %v2940_v36, %v2341_v37  ;;  %v2949_v36 = vld [vmem:[%s4391_s23] ss:$0 sm:$0xff] }
 0x73f   : > { %v3091_v39 = vpop.f32.mrf.mxu0 }
 0x740   : > { %v2345_v40 = vadd.f32 %v2342_v38, %v4083_v6  ;;  %v2383_v6 = vld [vmem:[%s4016_s19 + $0x8] sm:$0xff] }
 0x741   : > { %3097 = vmatpush3.msra.mxu1 %v2383_v6 }
 0x742   : > { %v2346_v41 = vsel %vm816_vm2, %v2345_v40, 0.0  ;;  %3098 = vmatprep.subr.mxu1 %v3675_v2 }
 0x743   : > { %2347 = vadd.xlane.f32.xlu1 %v2346_v41  ;;  %3099 = vmatpush3.msra.mxu1 %v2382_v49 }
 0x7cc   : > { %v2348_v42 = vpop.xlane.xlu1 %2347 }
 0x7cd   : > { %v2349_v43 = vmul.f32 0.03125, %v2348_v42 }
 0x7cf   : > { %v2350_v44 = vsub.f32 %v2345_v40, %v2349_v43 }
 0x7d1   : > { %v2351_v45 = vmul.f32 %v2350_v44, %v2350_v44  ;;  %v2372_v0 = vmul.f32 %v2942_v63, %v2350_v44 }
 0x7d3   : > { %v2352_v46 = vsel %vm816_vm2, %v2351_v45, 0.0 }
 0x7d4   : > { %2353 = vadd.xlane.f32.xlu0 %v2352_v46 }
 0x85d   : > { %v2354_v55 = vpop.xlane.xlu0 %2353 }
 0x85e   : > { %v2355_v56 = vmul.f32 0.032258064, %v2354_v55 }
 0x860   : > { %3293 = vrsqrt.f32 %v2355_v56  ;;  %vm2358_vm6 = vcmp.eq.f32.partialorder %v2355_v56, inf  ;;  %v2361_v59 = vand.u32 2147483648, %v2355_v56  ;;  %vm2360_vm7 = vcmp.eq.f32.partialorder %v2355_v56, 0.0 }
 0x86d   : > { %v3294_v57 = vpop.eup %3293 }
 0x86e   : > { %v2357_v58 = vmul.f32 %v3294_v57, %v2355_v56 }
 0x870   : > { %v2359_v60 = vsel %vm2358_vm6, %v2355_v56, %v2357_v58 }
 0x871   : > { %v2362_v61 = vsel %vm2360_vm7, %v2361_v59, %v2359_v60 }
 0x872   : > { %v2363_v62 = vadd.f32 1e-06, %v2362_v61 }
 0x874   : > { %3295 = vrcp.f32 %v2363_v62 }
 0x881   : > { %v3296_v1 = vpop.eup %3295 }
 0x882   : > { %v2373_v4 = vmul.f32 %v3296_v1, %v2372_v0 }
 0x884   : > { %v2381_v5 = vadd.f32 %v2943_v3, %v2373_v4 }
 0x886   : > { %3101 = vmatmul.mubr.msk.f32.vlgmr.msra.gmra.mxu1 %vm816_vm2, %v2381_v5 }
 0x946   : > { %v2462_v11 = vpop.f32.mrf.mxu1 }
 0x947   : > { %v2463_v12 = vadd.f32 %v2944_v10, %v2462_v11 }
 0x948   : > { %v3102_v13 = vpop.f32.mrf.mxu1 }
 0x949   : > { %v2466_v14 = vmax.f32 %v2463_v12, 0.0 }
 0x94b   : > { %3120 = vmatmul.mubr.msk.f32.vlgmr.msra.gmra.mxu0 %vm2482_vm8, %v2466_v14 }
 0xa0b   : > { %v2552_v16 = vpop.f32.mrf.mxu0 }
 0xa0c   : > { %v2553_v17 = vadd.f32 %v2946_v15, %v2552_v16 }
 0xa0d   : > { %v3121_v18 = vpop.f32.mrf.mxu0 }
 0xa0e   : > { %v2556_v19 = vadd.f32 %v2553_v17, %v2381_v5 }
 0xa10   : > { %v2557_v20 = vsel %vm816_vm2, %v2556_v19, 0.0 }
 0xa11   : > { %2558 = vadd.xlane.f32.xlu1 %v2557_v20 }
 0xa9a   : > { %v2559_v21 = vpop.xlane.xlu1 %2558 }
 0xa9b   : > { %v2560_v2 = vmul.f32 0.03125, %v2559_v21 }
 0xa9d   : > { %v2561_v22 = vsub.f32 %v2556_v19, %v2560_v2 }
 0xa9f   : > { %v2562_v23 = vmul.f32 %v2561_v22, %v2561_v22  ;;  %v2583_v34 = vmul.f32 %v2948_v33, %v2561_v22 }
 0xaa1   : > { %v2563_v24 = vsel %vm816_vm2, %v2562_v23, 0.0 }
 0xaa2   : > { %2564 = vadd.xlane.f32.xlu0 %v2563_v24 }
 0xb2b   : > { %v2565_v25 = vpop.xlane.xlu0 %2564 }
 0xb2c   : > { %v2566_v26 = vmul.f32 0.032258064, %v2565_v25 }
 0xb2e   : > { %3297 = vrsqrt.f32 %v2566_v26  ;;  %vm2569_vm9 = vcmp.eq.f32.partialorder %v2566_v26, inf  ;;  %v2572_v29 = vand.u32 2147483648, %v2566_v26  ;;  %vm2571_vm10 = vcmp.eq.f32.partialorder %v2566_v26, 0.0 }
 0xb3b   : > { %v3298_v27 = vpop.eup %3297 }
 0xb3c   : > { %v2568_v28 = vmul.f32 %v3298_v27, %v2566_v26 }
 0xb3e   : > { %v2570_v30 = vsel %vm2569_vm9, %v2566_v26, %v2568_v28 }
 0xb3f   : > { %v2573_v31 = vsel %vm2571_vm10, %v2572_v29, %v2570_v30 }
 0xb40   : > { %v2574_v32 = vadd.f32 1e-06, %v2573_v31 }
 0xb42   : > { %3299 = vrcp.f32 %v2574_v32 }
 0xb4f   : > { %v3300_v35 = vpop.eup %3299 }
 0xb50   : > { %v2584_v37 = vmul.f32 %v3300_v35, %v2583_v34  ;;  %2597 = sbr.rel (%p2950_p3) target bundleno = 2902 (0xb56), region = 112 }
 0xb52   : > { %v2592_v38 = vadd.f32 %v2949_v36, %v2584_v37 }
 0xb54   : > { %2593 = vst.msk [vmem:[#allocation2] sm:$0xff] %vm816_vm2, %v2592_v38 }
 0xb55   : > { %2598 = vst.msk [vmem:[%s776_s21] sm:$0xff] %vm816_vm2, %v2592_v38 }
 0xb56 PF: > { %s4393_s20 = sld [smem:[#allocation29_spill]]  ;;  %s2613_s30 = sshll.u32 %s776_s21, 4  ;;  %s2614_s30 = int_to_ptr.vmem [resolvable:$true] %s2613_s30 }
 0xb57   : > { %s4394_s4 = sld [smem:[#allocation25_spill]]  ;;  %s3525_s8 = scalar_lea.vmem %s2614_s30, 128 }
 0xb58   : > { %s4396_s1 = sld [smem:[#allocation52_spill]]  ;;  %p3526_p9 = scmp.ne.s32.totalorder %s2614_s30, %s3525_s8 }
 0xb59   : > { %s3685_s10 = smov [#allocation17]  }
 0xb5a   : > { %p3527_p10 = pnand %p3526_p9, %p3848_p12  ;;  %s3529_s11 = sshll.u32 %s3685_s10, 4  ;;  %s3530_s11 = int_to_ptr.vmem [resolvable:$false] %s3529_s11 }
 0xb5b   : > { %s3531_s12 = scalar_lea.vmem %s3530_s11, 256  ;;  %p3532_p11 = scmp.lt.s32.totalorder %s2614_s30, %s3530_s11 }
 0xb5c   : > { %s2952_s28 = sshll.u32 %s4393_s20, 7  ;;  %p3528_p5 = pneg %p3527_p10 }
 0xb5d   : > { %s4397_s2 = sand.u32 1, %s4394_s4   ;;  %p3533_p13 = scmp.lt.s32.totalorder %s3531_s12, %s3525_s8 }
 0xb5e   : > { %s2611_s27 = scalar_lea.hbm %s4396_s1, %s2952_s28  ;;  %s2600_s6 = scalar_lea.sflag [#allocation5], %s4397_s2 }
 0xb5f   : > { %p3534_p0 = por %p3533_p13, %p3532_p11 }
 0xb61   : > { %p3535_p1 = pnand %p3534_p0, %p3528_p5 }
 0xb63   : > { %3538 = shalt.err (!%p3535_p1)
}
 0xb64   : > { %s3539_s16 = scalar_lea.hbm %s2611_s27, 128  ;;  %s3543_s3 = scalar_lea.hbm %s4396_s1, 256 }
 0xb65   : > { %p3540_p7 = scmp.ne.s32.totalorder %s2611_s27, %s3539_s16  ;;  %p3544_p8 = scmp.lt.s32.totalorder %s2611_s27, %s4396_s1 }
 0xb66   : > { %p3545_p3 = scmp.lt.s32.totalorder %s3543_s3, %s3539_s16 }
 0xb67   : > { %p3541_p4 = pnand %p3540_p7, %p3848_p12 }
 0xb68   : > { %p3546_p9 = por %p3545_p3, %p3544_p8 }
 0xb69   : > { %p3542_p6 = pneg %p3541_p4 }
 0xb6b   : > { %p3547_p10 = pnand %p3546_p9, %p3542_p6 }
 0xb6d   : > { %3550 = shalt.err (!%p3547_p10)
}
 0xb6e   : > { %3142 = dma.vmem_to_hbm [thread:$0]  (%p3848_p12), %s2614_s30, 128, %s2611_s27, %s2600_s6  }
 0xb6f PF: > { %s4398_s25 = sld [smem:[#allocation24_spill]]  ;;  %p3174_p5 = scmp.ge.s32.totalorder %s3661_s18, 2 }
 0xb71   : > { %p3170_p11 = pnand %p3174_p5, %p3858_p2 }
 0xb73   : > { %p3171_p13 = pneg %p3170_p11 }
 0xb75   : > { %s2625_s22 = sand.u32 1, %s4398_s25  }
 0xb76   : > { %s2626_s17 = scalar_lea.sflag [#allocation5], %s2625_s22 }
 0xb77   : > { %3616 = dma.done.wait (%p3171_p13), %s2626_s17, 128  }
 0xb78   : > { %3618 = vsyncadd (%p3171_p13), %s2626_s17, 4294967168  ;;  %s41_s18 = sadd.s32 1, %s3661_s18   ;;  %s4400_s25 = sld [smem:[#allocation25_spill]] }
 0xb79   : > { %p38_p0 = scmp.ge.s32.totalorder %s41_s18, 6   ;;  %s4401_s26 = sld [smem:[#allocation26_spill]] }
 0xb7a   : > { %s4402_s27 = sld [smem:[#allocation36_spill]]  ;;  %s4409_s28 = smov %s3637_s29 }
 0xb7b   : > { %s4403_s14 = sld [smem:[#allocation27_spill]] }
 0xb7c   : > { %s4404_s30 = sld [smem:[#allocation35_spill]] }
 0xb7d   : > { %s4405_s7 = sld [smem:[#allocation30_spill]] }
 0xb7e   : > { %s4406_s15 = sld [smem:[#allocation31_spill]] }
 0xb7f   : > { %s4407_s16 = sld [smem:[#allocation33_spill]]  ;;  %40 = sbr.rel (!%p38_p0) target bundleno = 32 (0x20), region = 229 }
 0xb80   : > { %s4408_s17 = sld [smem:[#allocation34_spill]] }
 0xb81   : > { %s4410_s29 = smov %s4403_s14 }
 0xb83   : > { %s4411_s14 = smov %s4405_s7 }
 0xb84   :  { %2631 = vsyncpa [#allocation4], 1 }
 0xb85   :  { %2633 = vsyncpa [#allocation4 + $0x1], 1 }
 0xb86   :  { %2634 = vsyncpa [#allocation7], 1 }
 0xb87   :  { %2636 = vsyncpa [#allocation7 + $0x1], 1 }
 0xb88   :  { %2637 = vsyncpa [#allocation10], 1 }
 0xb89   :  { %2639 = vsyncpa [#allocation10 + $0x1], 1 }
 0xb8a   :  { %2640 = vsyncpa [#allocation13], 1 }
 0xb8b   :  { %2642 = vsyncpa [#allocation13 + $0x1], 1 }
 0xb8c   :  { %2643 = vsyncpa [#allocation16], 1 }
 0xb8d   :  { %2645 = vsyncpa [#allocation16 + $0x1], 1 }
 0xb8e   :  { %2646 = vsyncpa [#allocation5], 1 }
 0xb8f   :  { %2648 = vsyncpa [#allocation5 + $0x1], 1 }

</bundles_post_ra>
